<compile_context>
chip_gen: v5e
topology: v5e:2x2
jax: 0.10.0
libtpu: 0.0.40
codegen_flags: <defaults>
</compile_context>

<pallas_src>
import functools
import math

import jax
import jax.numpy as jnp
from jax.experimental import pallas as pl
from jax.experimental.pallas import tpu as pltpu


def _layer_norm(x, w, b, eps=1e-5):
    mu = jnp.mean(x, axis=-1, keepdims=True)
    var = jnp.mean((x - mu) ** 2, axis=-1, keepdims=True)
    return (x - mu) * jax.lax.rsqrt(var + eps) * w + b


def mab_kernel(q_ref, x_ref, wq_ref, wk_ref, wv_ref, wo_ref,
               ln1w_ref, ln1b_ref, w1_ref, w2_ref, ln2w_ref, ln2b_ref,
               o_ref, *, num_heads, compute_dtype, exact_softmax):
    Bt, Sq, Din = q_ref.shape
    _, Sk, _ = x_ref.shape
    cd = compute_dtype

    # Flatten the batch tile into the row (M) dim for the big matmuls.
    # Sq/Sk are kept multiples of 8 (f32 sublanes) so these reshapes are views.
    Qf = q_ref[...].reshape(Bt * Sq, Din).astype(cd)
    Xf = x_ref[...].reshape(Bt * Sk, Din).astype(cd)

    # Projections (weights already in cd; f32 accumulation on the MXU).
    q = jnp.dot(Qf, wq_ref[...], preferred_element_type=jnp.float32)  # (Bt*Sq, H)
    k = jnp.dot(Xf, wk_ref[...], preferred_element_type=jnp.float32)  # (Bt*Sk, H)
    v = jnp.dot(Xf, wv_ref[...], preferred_element_type=jnp.float32)  # (Bt*Sk, H)

    H = q.shape[-1]
    dh = H // num_heads
    # Fold 1/sqrt(d_head) into q once (single VPU mul over (Bt*Sq, H)).
    q_scaled = q * (1.0 / math.sqrt(dh))

    q3 = q_scaled.reshape(Bt, Sq, H)
    k3 = k.reshape(Bt, Sk, H)
    v3 = v.reshape(Bt, Sk, H)
    wo = wo_ref[...]  # (H, H) in cd, loaded once

    # Per-head attention with Wo folded in.  Heads are contiguous column slices
    # (matches transpose_qkv in PyTorch).  Each head output is immediately
    # pushed through its Wo row-slice and accumulated into a lane-dense
    # (Bt*Sq, H) f32 value -> no masked scratch stores, no concat epilogue.
    A = jnp.zeros((Bt * Sq, H), jnp.float32)
    for h in range(num_heads):
        sl = slice(h * dh, (h + 1) * dh)
        qh = q3[:, :, sl].astype(cd)                            # (Bt, Sq, dh)
        kh = k3[:, :, sl].astype(cd)                            # (Bt, Sk, dh)
        vh = v3[:, :, sl].astype(cd)                            # (Bt, Sk, dh)
        s = jnp.einsum('bqd,bkd->bqk', qh, kh,
                       preferred_element_type=jnp.float32)      # (Bt, Sq, Sk)
        s = s - jnp.max(s, axis=-1, keepdims=True)
        p = jnp.exp(s)
        denom = jnp.sum(p, axis=-1, keepdims=True)
        if exact_softmax:
            attn = p / denom
        else:
            attn = p * pl.reciprocal(denom, approx=True)        # EUP slot
        oh = jnp.einsum('bqk,bkd->bqd', attn.astype(cd), vh,
                        preferred_element_type=jnp.float32)     # (Bt, Sq, dh)
        A = A + jnp.dot(oh.reshape(Bt * Sq, dh).astype(cd), wo[sl, :],
                        preferred_element_type=jnp.float32)

    # Residual uses W_q(Q) (not Q itself), per MAB.forward.  Dropout = identity.
    Hr = _layer_norm(A + q, ln1w_ref[...], ln1b_ref[...])

    # Position-wise FFN (no bias); elementwise math stays f32 (v5e VPU/EUP).
    h1 = jnp.maximum(
        jnp.dot(Hr.astype(cd), w1_ref[...], preferred_element_type=jnp.float32),
        0.0)
    ffn = jnp.dot(h1.astype(cd), w2_ref[...], preferred_element_type=jnp.float32)

    O = _layer_norm(ffn + Hr, ln2w_ref[...], ln2b_ref[...])
    o_ref[...] = O.reshape(Bt, Sq, H).astype(o_ref.dtype)


def _pick_batch_tile(B, Sq, Sk, target_rows=512):
    """Largest divisor of B with Bt*max(Sq,Sk) rows <= target_rows, while
    keeping >= 2 grid steps so both v7x TensorCores get work ('parallel' axis)."""
    rows = max(Sq, Sk, 1)
    best = 1
    for d in range(1, B + 1):
        if B % d:
            continue
        if d * rows > max(target_rows, rows):
            continue
        if B >= 2 and B // d < 2:
            continue
        best = d
    return best


def _estimate_vmem_bytes(Bt, Sq, Sk, Din, H, F, compute_dtype):
    cdb = jnp.dtype(compute_dtype).itemsize
    weights = (3 * Din * H + H * H + H * F + F * H) * cdb + 4 * H * 4
    io_tiles = 2 * ((Bt * Sq * Din + Bt * Sk * Din) * 4 + Bt * Sq * H * 4)
    acts = (3 * Bt * max(Sq, Sk) * H + Bt * Sq * Sk + Bt * Sq * F
            + 4 * Bt * Sq * H) * 4
    return weights + io_tiles + acts


def mab_forward(Q, X, params, num_heads, *, compute_dtype=jnp.float32,
                batch_tile=None, exact_softmax=False):
    B, Sq, Din = Q.shape
    _, Sk, _ = X.shape
    H = params["Wq"].shape[1]
    F = params["W1"].shape[1]

    Bt = batch_tile if batch_tile is not None else _pick_batch_tile(B, Sq, Sk)
    assert B % Bt == 0, "batch tile must divide batch"
    grid = (B // Bt,)

    cd = compute_dtype
    # Pre-cast grid-invariant weights once in HBM (halves their DMA and VMEM
    # footprint for bf16 and removes per-step casts).  LN params stay f32.
    wq = params["Wq"].astype(cd)
    wk = params["Wk"].astype(cd)
    wv = params["Wv"].astype(cd)
    wo = params["Wo"].astype(cd)
    w1 = params["W1"].astype(cd)
    w2 = params["W2"].astype(cd)

    vmem_limit = int(min(
        64 * 2**20,
        max(32 * 2**20, 3 * _estimate_vmem_bytes(Bt, Sq, Sk, Din, H, F, cd))))
    # TODO(synk): at production D/F on v7x (64 MiB VMEM), stream W1/W2 through an
    # extra trailing "arbitrary" grid axis instead of keeping them fully resident.

    kernel = functools.partial(mab_kernel, num_heads=num_heads,
                               compute_dtype=cd, exact_softmax=exact_softmax)

    def build_and_run(single_buffer_weights):
        def wspec(shape):
            # Constant-index blocks are fetched once; single-buffering halves
            # their VMEM residency (main VMEM lever for v7x).
            if single_buffer_weights:
                return pl.BlockSpec(shape, lambda b: (0, 0),
                                    pipeline_mode=pl.Buffered(1))
            return pl.BlockSpec(shape, lambda b: (0, 0))

        return pl.pallas_call(
            kernel,
            out_shape=jax.ShapeDtypeStruct((B, Sq, H), jnp.float32),
            grid_spec=pltpu.PrefetchScalarGridSpec(
                num_scalar_prefetch=0,
                grid=grid,
                in_specs=[
                    pl.BlockSpec((Bt, Sq, Din), lambda b: (b, 0, 0)),   # Q tile
                    pl.BlockSpec((Bt, Sk, Din), lambda b: (b, 0, 0)),   # X tile
                    wspec((Din, H)),                                    # Wq
                    wspec((Din, H)),                                    # Wk
                    wspec((Din, H)),                                    # Wv
                    wspec((H, H)),                                      # Wo
                    wspec((1, H)),                                      # ln1 w
                    wspec((1, H)),                                      # ln1 b
                    wspec((H, F)),                                      # ffn W1
                    wspec((F, H)),                                      # ffn W2
                    wspec((1, H)),                                      # ln2 w
                    wspec((1, H)),                                      # ln2 b
                ],
                out_specs=pl.BlockSpec((Bt, Sq, H), lambda b: (b, 0, 0)),
            ),
            compiler_params=pltpu.CompilerParams(
                dimension_semantics=("parallel",),
                vmem_limit_bytes=vmem_limit),
        )(Q, X, wq, wk, wv, wo,
          params["ln1_w"], params["ln1_b"], w1, w2,
          params["ln2_w"], params["ln2_b"])

    try:
        return build_and_run(True)
    except Exception:
        # pl.Buffered(1) not accepted by this jax build / pipeline:
        # fall back to default double-buffered weight blocks.
        return build_and_run(False)


def mab_reference(Q, X, params, num_heads):
    """Pure-JAX reference mirroring the PyTorch MAB forward (post-LN path)."""
    q = Q @ params["Wq"]
    k = X @ params["Wk"]
    v = X @ params["Wv"]
    B, Sq, H = q.shape
    dh = H // num_heads

    def split(t):  # (B, S, H) -> (B*nh, S, dh)
        t = t.reshape(t.shape[0], t.shape[1], num_heads, dh)
        return jnp.transpose(t, (0, 2, 1, 3)).reshape(-1, t.shape[1], dh)

    qh, kh, vh = split(q), split(k), split(v)
    scores = jnp.einsum("bqd,bkd->bqk", qh, kh) / math.sqrt(dh)
    attn = jax.nn.softmax(scores, axis=-1)
    out = jnp.einsum("bqk,bkd->bqd", attn, vh)
    out = out.reshape(B, num_heads, Sq, dh)
    out = jnp.transpose(out, (0, 2, 1, 3)).reshape(B, Sq, H)
    A = out @ params["Wo"]

    def ln(x, w, b):
        mu = x.mean(-1, keepdims=True)
        var = ((x - mu) ** 2).mean(-1, keepdims=True)
        return (x - mu) / jnp.sqrt(var + 1e-5) * w + b

    Hh = ln(A + q, params["ln1_w"], params["ln1_b"])
    ffn = jnp.maximum(Hh @ params["W1"], 0.0) @ params["W2"]
    return ln(ffn + Hh, params["ln2_w"], params["ln2_b"])


if __name__ == "__main__":
    # TODO(synk): valid_lens masked softmax, q_mult/kv_mult additive-attention
    # path, training-mode dropout, pre_ln variant and num_out head are not
    # implemented (module defaults are used).
    B, Sq, Sk = 2, 8, 8
    num_hiddens, ffn_hiddens, num_heads = 32, 64, 4
    Din = num_hiddens  # LazyLinear input dim chosen equal to num_hiddens

    key = jax.random.PRNGKey(0)
    ks = jax.random.split(key, 8)

    def init(k, shape, fan_in):
        bound = 1.0 / math.sqrt(fan_in)
        return jax.random.uniform(k, shape, jnp.float32, -bound, bound)

    params = {
        "Wq": init(ks[0], (Din, num_hiddens), Din),
        "Wk": init(ks[1], (Din, num_hiddens), Din),
        "Wv": init(ks[2], (Din, num_hiddens), Din),
        "Wo": init(ks[3], (num_hiddens, num_hiddens), num_hiddens),
        "W1": init(ks[4], (num_hiddens, ffn_hiddens), num_hiddens),
        "W2": init(ks[5], (ffn_hiddens, num_hiddens), ffn_hiddens),
        "ln1_w": jnp.ones((1, num_hiddens), jnp.float32),
        "ln1_b": jnp.zeros((1, num_hiddens), jnp.float32),
        "ln2_w": jnp.ones((1, num_hiddens), jnp.float32),
        "ln2_b": jnp.zeros((1, num_hiddens), jnp.float32),
    }

    Q = jax.random.normal(ks[6], (B, Sq, Din), jnp.float32)
    X = jax.random.normal(ks[7], (B, Sk, Din), jnp.float32)

    ref = mab_reference(Q, X, params, num_heads)

    # f32 operands + exact softmax division.  Tolerance covers possible
    # reduced-precision MXU passes for f32 matmul operands.
    out_f32 = jax.block_until_ready(
        mab_forward(Q, X, params, num_heads, compute_dtype=jnp.float32,
                    exact_softmax=True))
    assert out_f32.shape == (B, Sq, num_hiddens)
    assert jnp.allclose(out_f32, ref, atol=2e-2, rtol=2e-2), "f32 kernel mismatch"

    # bf16 matmul operands (v6e/v7x fast path), f32 accumulation, approx recip.
    out_bf16 = jax.block_until_ready(
        mab_forward(Q, X, params, num_heads, compute_dtype=jnp.bfloat16))
    assert out_bf16.shape == (B, Sq, num_hiddens)
    assert jnp.allclose(out_bf16, ref, atol=1e-1, rtol=1e-1), "bf16 kernel mismatch"

    print("KERNEL_OK")
</pallas_src>

<mosaic_0001>
module attributes {stable_mosaic.version = 11 : i64} {
  func.func @mab_kernel(%arg0: i32, %arg1: memref<1x8x32xf32, #tpu.memory_space<vmem>>, %arg2: memref<1x8x32xf32, #tpu.memory_space<vmem>>, %arg3: memref<32x32xf32, #tpu.memory_space<vmem>>, %arg4: memref<32x32xf32, #tpu.memory_space<vmem>>, %arg5: memref<32x32xf32, #tpu.memory_space<vmem>>, %arg6: memref<32x32xf32, #tpu.memory_space<vmem>>, %arg7: memref<1x32xf32, #tpu.memory_space<vmem>>, %arg8: memref<1x32xf32, #tpu.memory_space<vmem>>, %arg9: memref<32x64xf32, #tpu.memory_space<vmem>>, %arg10: memref<64x32xf32, #tpu.memory_space<vmem>>, %arg11: memref<1x32xf32, #tpu.memory_space<vmem>>, %arg12: memref<1x32xf32, #tpu.memory_space<vmem>>, %arg13: memref<1x8x32xf32, #tpu.memory_space<vmem>>) attributes {dimension_semantics = [#tpu.dimension_semantics<parallel>], iteration_bounds = array<i64: 2>, scalar_prefetch = 0 : i64, scratch_operands = 0 : i64, tpu.core_type = #tpu.core_type<tc>, window_params = [{transform_indices = @transform_0, window_bounds = array<i64: 1, 8, 32>}, {transform_indices = @transform_1, window_bounds = array<i64: 1, 8, 32>}, {pipeline_mode = #tpu.pipeline_mode<synchronous>, transform_indices = @transform_2, window_bounds = array<i64: 32, 32>}, {pipeline_mode = #tpu.pipeline_mode<synchronous>, transform_indices = @transform_3, window_bounds = array<i64: 32, 32>}, {pipeline_mode = #tpu.pipeline_mode<synchronous>, transform_indices = @transform_4, window_bounds = array<i64: 32, 32>}, {pipeline_mode = #tpu.pipeline_mode<synchronous>, transform_indices = @transform_5, window_bounds = array<i64: 32, 32>}, {pipeline_mode = #tpu.pipeline_mode<synchronous>, transform_indices = @transform_6, window_bounds = array<i64: 1, 32>}, {pipeline_mode = #tpu.pipeline_mode<synchronous>, transform_indices = @transform_7, window_bounds = array<i64: 1, 32>}, {pipeline_mode = #tpu.pipeline_mode<synchronous>, transform_indices = @transform_8, window_bounds = array<i64: 32, 64>}, {pipeline_mode = #tpu.pipeline_mode<synchronous>, transform_indices = @transform_9, window_bounds = array<i64: 64, 32>}, {pipeline_mode = #tpu.pipeline_mode<synchronous>, transform_indices = @transform_10, window_bounds = array<i64: 1, 32>}, {pipeline_mode = #tpu.pipeline_mode<synchronous>, transform_indices = @transform_11, window_bounds = array<i64: 1, 32>}, {transform_indices = @transform_12, window_bounds = array<i64: 1, 8, 32>}]} {
    %c0 = arith.constant 0 : index
    %c0_0 = arith.constant 0 : index
    %c0_1 = arith.constant 0 : index
    %0 = vector.load %arg1[%c0, %c0_0, %c0_1] : memref<1x8x32xf32, #tpu.memory_space<vmem>>, vector<1x8x32xf32>
    %1 = vector.shape_cast %0 : vector<1x8x32xf32> to vector<8x32xf32>
    %c0_2 = arith.constant 0 : index
    %c0_3 = arith.constant 0 : index
    %c0_4 = arith.constant 0 : index
    %2 = vector.load %arg2[%c0_2, %c0_3, %c0_4] : memref<1x8x32xf32, #tpu.memory_space<vmem>>, vector<1x8x32xf32>
    %3 = vector.shape_cast %2 : vector<1x8x32xf32> to vector<8x32xf32>
    %c0_5 = arith.constant 0 : index
    %c0_6 = arith.constant 0 : index
    %4 = vector.load %arg3[%c0_5, %c0_6] : memref<32x32xf32, #tpu.memory_space<vmem>>, vector<32x32xf32>
    %cst = arith.constant dense<0.000000e+00> : vector<8x32xf32>
    %5 = tpu.matmul %1, %4, %cst {dimension_numbers = #tpu.dot_dimension_numbers<[1], [0], [0], [1], [0, 0, 1, 1], [], []>} : vector<8x32xf32>, vector<32x32xf32>, vector<8x32xf32> -> vector<8x32xf32>
    %c0_7 = arith.constant 0 : index
    %c0_8 = arith.constant 0 : index
    %6 = vector.load %arg4[%c0_7, %c0_8] : memref<32x32xf32, #tpu.memory_space<vmem>>, vector<32x32xf32>
    %cst_9 = arith.constant dense<0.000000e+00> : vector<8x32xf32>
    %7 = tpu.matmul %3, %6, %cst_9 {dimension_numbers = #tpu.dot_dimension_numbers<[1], [0], [0], [1], [0, 0, 1, 1], [], []>} : vector<8x32xf32>, vector<32x32xf32>, vector<8x32xf32> -> vector<8x32xf32>
    %c0_10 = arith.constant 0 : index
    %c0_11 = arith.constant 0 : index
    %8 = vector.load %arg5[%c0_10, %c0_11] : memref<32x32xf32, #tpu.memory_space<vmem>>, vector<32x32xf32>
    %cst_12 = arith.constant dense<0.000000e+00> : vector<8x32xf32>
    %9 = tpu.matmul %3, %8, %cst_12 {dimension_numbers = #tpu.dot_dimension_numbers<[1], [0], [0], [1], [0, 0, 1, 1], [], []>} : vector<8x32xf32>, vector<32x32xf32>, vector<8x32xf32> -> vector<8x32xf32>
    %cst_13 = arith.constant 0.353553385 : f32
    %10 = vector.broadcast %cst_13 : f32 to vector<8x32xf32>
    %11 = arith.mulf %5, %10 : vector<8x32xf32>
    %12 = vector.shape_cast %11 : vector<8x32xf32> to vector<1x8x32xf32>
    %13 = vector.shape_cast %7 : vector<8x32xf32> to vector<1x8x32xf32>
    %14 = vector.shape_cast %9 : vector<8x32xf32> to vector<1x8x32xf32>
    %c0_14 = arith.constant 0 : index
    %c0_15 = arith.constant 0 : index
    %15 = vector.load %arg6[%c0_14, %c0_15] : memref<32x32xf32, #tpu.memory_space<vmem>>, vector<32x32xf32>
    %cst_16 = arith.constant 0.000000e+00 : f32
    %16 = vector.broadcast %cst_16 : f32 to vector<8x32xf32>
    %17 = vector.extract_strided_slice %12 {offsets = [0, 0, 0], sizes = [1, 8, 8], strides = [1, 1, 1]} : vector<1x8x32xf32> to vector<1x8x8xf32>
    %18 = vector.extract_strided_slice %13 {offsets = [0, 0, 0], sizes = [1, 8, 8], strides = [1, 1, 1]} : vector<1x8x32xf32> to vector<1x8x8xf32>
    %19 = vector.extract_strided_slice %14 {offsets = [0, 0, 0], sizes = [1, 8, 8], strides = [1, 1, 1]} : vector<1x8x32xf32> to vector<1x8x8xf32>
    "tpu.trace_start"() <{level = 10 : i32, message = "bqd,bkd->bqk"}> : () -> ()
    %cst_17 = arith.constant dense<0.000000e+00> : vector<1x8x8xf32>
    %20 = tpu.matmul %17, %18, %cst_17 {dimension_numbers = #tpu.dot_dimension_numbers<[2], [2], [1], [1], [0, 0, 0, 1, 1, 1], [0], [0]>} : vector<1x8x8xf32>, vector<1x8x8xf32>, vector<1x8x8xf32> -> vector<1x8x8xf32>
    "tpu.trace_stop"() : () -> ()
    %cst_18 = arith.constant dense<0xFF800000> : vector<1x8xf32>
    %21 = vector.multi_reduction <maximumf>, %20, %cst_18 [2] : vector<1x8x8xf32> to vector<1x8xf32>
    %22 = vector.shape_cast %21 : vector<1x8xf32> to vector<1x8x1xf32>
    %23 = vector.broadcast %22 : vector<1x8x1xf32> to vector<1x8x8xf32>
    %24 = arith.subf %20, %23 : vector<1x8x8xf32>
    %25 = math.exp %24 : vector<1x8x8xf32>
    %cst_19 = arith.constant dense<0.000000e+00> : vector<1x8xf32>
    %26 = vector.multi_reduction <add>, %25, %cst_19 [2] : vector<1x8x8xf32> to vector<1x8xf32>
    %27 = vector.shape_cast %26 : vector<1x8xf32> to vector<1x8x1xf32>
    %28 = vector.broadcast %27 : vector<1x8x1xf32> to vector<1x8x8xf32>
    %29 = arith.divf %25, %28 : vector<1x8x8xf32>
    "tpu.trace_start"() <{level = 10 : i32, message = "bqk,bkd->bqd"}> : () -> ()
    %cst_20 = arith.constant dense<0.000000e+00> : vector<1x8x8xf32>
    %30 = tpu.matmul %29, %19, %cst_20 {dimension_numbers = #tpu.dot_dimension_numbers<[2], [1], [1], [2], [0, 0, 0, 1, 1, 2], [0], [0]>} : vector<1x8x8xf32>, vector<1x8x8xf32>, vector<1x8x8xf32> -> vector<1x8x8xf32>
    "tpu.trace_stop"() : () -> ()
    %31 = vector.shape_cast %30 : vector<1x8x8xf32> to vector<8x8xf32>
    %32 = vector.extract_strided_slice %15 {offsets = [0, 0], sizes = [8, 32], strides = [1, 1]} : vector<32x32xf32> to vector<8x32xf32>
    %cst_21 = arith.constant dense<0.000000e+00> : vector<8x32xf32>
    %33 = tpu.matmul %31, %32, %cst_21 {dimension_numbers = #tpu.dot_dimension_numbers<[1], [0], [0], [1], [0, 0, 1, 1], [], []>} : vector<8x8xf32>, vector<8x32xf32>, vector<8x32xf32> -> vector<8x32xf32>
    %34 = arith.addf %16, %33 : vector<8x32xf32>
    %35 = vector.extract_strided_slice %12 {offsets = [0, 0, 8], sizes = [1, 8, 8], strides = [1, 1, 1]} : vector<1x8x32xf32> to vector<1x8x8xf32>
    %36 = vector.extract_strided_slice %13 {offsets = [0, 0, 8], sizes = [1, 8, 8], strides = [1, 1, 1]} : vector<1x8x32xf32> to vector<1x8x8xf32>
    %37 = vector.extract_strided_slice %14 {offsets = [0, 0, 8], sizes = [1, 8, 8], strides = [1, 1, 1]} : vector<1x8x32xf32> to vector<1x8x8xf32>
    "tpu.trace_start"() <{level = 10 : i32, message = "bqd,bkd->bqk"}> : () -> ()
    %cst_22 = arith.constant dense<0.000000e+00> : vector<1x8x8xf32>
    %38 = tpu.matmul %35, %36, %cst_22 {dimension_numbers = #tpu.dot_dimension_numbers<[2], [2], [1], [1], [0, 0, 0, 1, 1, 1], [0], [0]>} : vector<1x8x8xf32>, vector<1x8x8xf32>, vector<1x8x8xf32> -> vector<1x8x8xf32>
    "tpu.trace_stop"() : () -> ()
    %cst_23 = arith.constant dense<0xFF800000> : vector<1x8xf32>
    %39 = vector.multi_reduction <maximumf>, %38, %cst_23 [2] : vector<1x8x8xf32> to vector<1x8xf32>
    %40 = vector.shape_cast %39 : vector<1x8xf32> to vector<1x8x1xf32>
    %41 = vector.broadcast %40 : vector<1x8x1xf32> to vector<1x8x8xf32>
    %42 = arith.subf %38, %41 : vector<1x8x8xf32>
    %43 = math.exp %42 : vector<1x8x8xf32>
    %cst_24 = arith.constant dense<0.000000e+00> : vector<1x8xf32>
    %44 = vector.multi_reduction <add>, %43, %cst_24 [2] : vector<1x8x8xf32> to vector<1x8xf32>
    %45 = vector.shape_cast %44 : vector<1x8xf32> to vector<1x8x1xf32>
    %46 = vector.broadcast %45 : vector<1x8x1xf32> to vector<1x8x8xf32>
    %47 = arith.divf %43, %46 : vector<1x8x8xf32>
    "tpu.trace_start"() <{level = 10 : i32, message = "bqk,bkd->bqd"}> : () -> ()
    %cst_25 = arith.constant dense<0.000000e+00> : vector<1x8x8xf32>
    %48 = tpu.matmul %47, %37, %cst_25 {dimension_numbers = #tpu.dot_dimension_numbers<[2], [1], [1], [2], [0, 0, 0, 1, 1, 2], [0], [0]>} : vector<1x8x8xf32>, vector<1x8x8xf32>, vector<1x8x8xf32> -> vector<1x8x8xf32>
    "tpu.trace_stop"() : () -> ()
    %49 = vector.shape_cast %48 : vector<1x8x8xf32> to vector<8x8xf32>
    %50 = vector.extract_strided_slice %15 {offsets = [8, 0], sizes = [8, 32], strides = [1, 1]} : vector<32x32xf32> to vector<8x32xf32>
    %cst_26 = arith.constant dense<0.000000e+00> : vector<8x32xf32>
    %51 = tpu.matmul %49, %50, %cst_26 {dimension_numbers = #tpu.dot_dimension_numbers<[1], [0], [0], [1], [0, 0, 1, 1], [], []>} : vector<8x8xf32>, vector<8x32xf32>, vector<8x32xf32> -> vector<8x32xf32>
    %52 = arith.addf %34, %51 : vector<8x32xf32>
    %53 = vector.extract_strided_slice %12 {offsets = [0, 0, 16], sizes = [1, 8, 8], strides = [1, 1, 1]} : vector<1x8x32xf32> to vector<1x8x8xf32>
    %54 = vector.extract_strided_slice %13 {offsets = [0, 0, 16], sizes = [1, 8, 8], strides = [1, 1, 1]} : vector<1x8x32xf32> to vector<1x8x8xf32>
    %55 = vector.extract_strided_slice %14 {offsets = [0, 0, 16], sizes = [1, 8, 8], strides = [1, 1, 1]} : vector<1x8x32xf32> to vector<1x8x8xf32>
    "tpu.trace_start"() <{level = 10 : i32, message = "bqd,bkd->bqk"}> : () -> ()
    %cst_27 = arith.constant dense<0.000000e+00> : vector<1x8x8xf32>
    %56 = tpu.matmul %53, %54, %cst_27 {dimension_numbers = #tpu.dot_dimension_numbers<[2], [2], [1], [1], [0, 0, 0, 1, 1, 1], [0], [0]>} : vector<1x8x8xf32>, vector<1x8x8xf32>, vector<1x8x8xf32> -> vector<1x8x8xf32>
    "tpu.trace_stop"() : () -> ()
    %cst_28 = arith.constant dense<0xFF800000> : vector<1x8xf32>
    %57 = vector.multi_reduction <maximumf>, %56, %cst_28 [2] : vector<1x8x8xf32> to vector<1x8xf32>
    %58 = vector.shape_cast %57 : vector<1x8xf32> to vector<1x8x1xf32>
    %59 = vector.broadcast %58 : vector<1x8x1xf32> to vector<1x8x8xf32>
    %60 = arith.subf %56, %59 : vector<1x8x8xf32>
    %61 = math.exp %60 : vector<1x8x8xf32>
    %cst_29 = arith.constant dense<0.000000e+00> : vector<1x8xf32>
    %62 = vector.multi_reduction <add>, %61, %cst_29 [2] : vector<1x8x8xf32> to vector<1x8xf32>
    %63 = vector.shape_cast %62 : vector<1x8xf32> to vector<1x8x1xf32>
    %64 = vector.broadcast %63 : vector<1x8x1xf32> to vector<1x8x8xf32>
    %65 = arith.divf %61, %64 : vector<1x8x8xf32>
    "tpu.trace_start"() <{level = 10 : i32, message = "bqk,bkd->bqd"}> : () -> ()
    %cst_30 = arith.constant dense<0.000000e+00> : vector<1x8x8xf32>
    %66 = tpu.matmul %65, %55, %cst_30 {dimension_numbers = #tpu.dot_dimension_numbers<[2], [1], [1], [2], [0, 0, 0, 1, 1, 2], [0], [0]>} : vector<1x8x8xf32>, vector<1x8x8xf32>, vector<1x8x8xf32> -> vector<1x8x8xf32>
    "tpu.trace_stop"() : () -> ()
    %67 = vector.shape_cast %66 : vector<1x8x8xf32> to vector<8x8xf32>
    %68 = vector.extract_strided_slice %15 {offsets = [16, 0], sizes = [8, 32], strides = [1, 1]} : vector<32x32xf32> to vector<8x32xf32>
    %cst_31 = arith.constant dense<0.000000e+00> : vector<8x32xf32>
    %69 = tpu.matmul %67, %68, %cst_31 {dimension_numbers = #tpu.dot_dimension_numbers<[1], [0], [0], [1], [0, 0, 1, 1], [], []>} : vector<8x8xf32>, vector<8x32xf32>, vector<8x32xf32> -> vector<8x32xf32>
    %70 = arith.addf %52, %69 : vector<8x32xf32>
    %71 = vector.extract_strided_slice %12 {offsets = [0, 0, 24], sizes = [1, 8, 8], strides = [1, 1, 1]} : vector<1x8x32xf32> to vector<1x8x8xf32>
    %72 = vector.extract_strided_slice %13 {offsets = [0, 0, 24], sizes = [1, 8, 8], strides = [1, 1, 1]} : vector<1x8x32xf32> to vector<1x8x8xf32>
    %73 = vector.extract_strided_slice %14 {offsets = [0, 0, 24], sizes = [1, 8, 8], strides = [1, 1, 1]} : vector<1x8x32xf32> to vector<1x8x8xf32>
    "tpu.trace_start"() <{level = 10 : i32, message = "bqd,bkd->bqk"}> : () -> ()
    %cst_32 = arith.constant dense<0.000000e+00> : vector<1x8x8xf32>
    %74 = tpu.matmul %71, %72, %cst_32 {dimension_numbers = #tpu.dot_dimension_numbers<[2], [2], [1], [1], [0, 0, 0, 1, 1, 1], [0], [0]>} : vector<1x8x8xf32>, vector<1x8x8xf32>, vector<1x8x8xf32> -> vector<1x8x8xf32>
    "tpu.trace_stop"() : () -> ()
    %cst_33 = arith.constant dense<0xFF800000> : vector<1x8xf32>
    %75 = vector.multi_reduction <maximumf>, %74, %cst_33 [2] : vector<1x8x8xf32> to vector<1x8xf32>
    %76 = vector.shape_cast %75 : vector<1x8xf32> to vector<1x8x1xf32>
    %77 = vector.broadcast %76 : vector<1x8x1xf32> to vector<1x8x8xf32>
    %78 = arith.subf %74, %77 : vector<1x8x8xf32>
    %79 = math.exp %78 : vector<1x8x8xf32>
    %cst_34 = arith.constant dense<0.000000e+00> : vector<1x8xf32>
    %80 = vector.multi_reduction <add>, %79, %cst_34 [2] : vector<1x8x8xf32> to vector<1x8xf32>
    %81 = vector.shape_cast %80 : vector<1x8xf32> to vector<1x8x1xf32>
    %82 = vector.broadcast %81 : vector<1x8x1xf32> to vector<1x8x8xf32>
    %83 = arith.divf %79, %82 : vector<1x8x8xf32>
    "tpu.trace_start"() <{level = 10 : i32, message = "bqk,bkd->bqd"}> : () -> ()
    %cst_35 = arith.constant dense<0.000000e+00> : vector<1x8x8xf32>
    %84 = tpu.matmul %83, %73, %cst_35 {dimension_numbers = #tpu.dot_dimension_numbers<[2], [1], [1], [2], [0, 0, 0, 1, 1, 2], [0], [0]>} : vector<1x8x8xf32>, vector<1x8x8xf32>, vector<1x8x8xf32> -> vector<1x8x8xf32>
    "tpu.trace_stop"() : () -> ()
    %85 = vector.shape_cast %84 : vector<1x8x8xf32> to vector<8x8xf32>
    %86 = vector.extract_strided_slice %15 {offsets = [24, 0], sizes = [8, 32], strides = [1, 1]} : vector<32x32xf32> to vector<8x32xf32>
    %cst_36 = arith.constant dense<0.000000e+00> : vector<8x32xf32>
    %87 = tpu.matmul %85, %86, %cst_36 {dimension_numbers = #tpu.dot_dimension_numbers<[1], [0], [0], [1], [0, 0, 1, 1], [], []>} : vector<8x8xf32>, vector<8x32xf32>, vector<8x32xf32> -> vector<8x32xf32>
    %88 = arith.addf %70, %87 : vector<8x32xf32>
    %89 = arith.addf %88, %5 : vector<8x32xf32>
    %c0_37 = arith.constant 0 : index
    %c0_38 = arith.constant 0 : index
    %90 = vector.load %arg7[%c0_37, %c0_38] : memref<1x32xf32, #tpu.memory_space<vmem>>, vector<1x32xf32>
    %c0_39 = arith.constant 0 : index
    %c0_40 = arith.constant 0 : index
    %91 = vector.load %arg8[%c0_39, %c0_40] : memref<1x32xf32, #tpu.memory_space<vmem>>, vector<1x32xf32>
    %cst_41 = arith.constant dense<0.000000e+00> : vector<8xf32>
    %92 = vector.multi_reduction <add>, %89, %cst_41 [1] : vector<8x32xf32> to vector<8xf32>
    %93 = vector.shape_cast %92 : vector<8xf32> to vector<8x1xf32>
    %cst_42 = arith.constant 3.200000e+01 : f32
    %94 = vector.broadcast %cst_42 : f32 to vector<8x1xf32>
    %95 = arith.divf %93, %94 : vector<8x1xf32>
    %96 = vector.broadcast %95 : vector<8x1xf32> to vector<8x32xf32>
    %97 = arith.subf %89, %96 : vector<8x32xf32>
    %98 = arith.mulf %97, %97 : vector<8x32xf32>
    %cst_43 = arith.constant dense<0.000000e+00> : vector<8xf32>
    %99 = vector.multi_reduction <add>, %98, %cst_43 [1] : vector<8x32xf32> to vector<8xf32>
    %100 = vector.shape_cast %99 : vector<8xf32> to vector<8x1xf32>
    %cst_44 = arith.constant 3.200000e+01 : f32
    %101 = vector.broadcast %cst_44 : f32 to vector<8x1xf32>
    %102 = arith.divf %100, %101 : vector<8x1xf32>
    %103 = vector.broadcast %95 : vector<8x1xf32> to vector<8x32xf32>
    %104 = arith.subf %89, %103 : vector<8x32xf32>
    %cst_45 = arith.constant 9.99999974E-6 : f32
    %105 = vector.broadcast %cst_45 : f32 to vector<8x1xf32>
    %106 = arith.addf %102, %105 : vector<8x1xf32>
    %107 = math.rsqrt %106 : vector<8x1xf32>
    %108 = vector.broadcast %107 : vector<8x1xf32> to vector<8x32xf32>
    %109 = arith.mulf %104, %108 : vector<8x32xf32>
    %110 = vector.broadcast %90 : vector<1x32xf32> to vector<8x32xf32>
    %111 = arith.mulf %109, %110 : vector<8x32xf32>
    %112 = vector.broadcast %91 : vector<1x32xf32> to vector<8x32xf32>
    %113 = arith.addf %111, %112 : vector<8x32xf32>
    %c0_46 = arith.constant 0 : index
    %c0_47 = arith.constant 0 : index
    %114 = vector.load %arg9[%c0_46, %c0_47] : memref<32x64xf32, #tpu.memory_space<vmem>>, vector<32x64xf32>
    %cst_48 = arith.constant dense<0.000000e+00> : vector<8x64xf32>
    %115 = tpu.matmul %113, %114, %cst_48 {dimension_numbers = #tpu.dot_dimension_numbers<[1], [0], [0], [1], [0, 0, 1, 1], [], []>} : vector<8x32xf32>, vector<32x64xf32>, vector<8x64xf32> -> vector<8x64xf32>
    %cst_49 = arith.constant 0.000000e+00 : f32
    %116 = vector.broadcast %cst_49 : f32 to vector<8x64xf32>
    %117 = arith.maximumf %115, %116 : vector<8x64xf32>
    %c0_50 = arith.constant 0 : index
    %c0_51 = arith.constant 0 : index
    %118 = vector.load %arg10[%c0_50, %c0_51] : memref<64x32xf32, #tpu.memory_space<vmem>>, vector<64x32xf32>
    %cst_52 = arith.constant dense<0.000000e+00> : vector<8x32xf32>
    %119 = tpu.matmul %117, %118, %cst_52 {dimension_numbers = #tpu.dot_dimension_numbers<[1], [0], [0], [1], [0, 0, 1, 1], [], []>} : vector<8x64xf32>, vector<64x32xf32>, vector<8x32xf32> -> vector<8x32xf32>
    %120 = arith.addf %119, %113 : vector<8x32xf32>
    %c0_53 = arith.constant 0 : index
    %c0_54 = arith.constant 0 : index
    %121 = vector.load %arg11[%c0_53, %c0_54] : memref<1x32xf32, #tpu.memory_space<vmem>>, vector<1x32xf32>
    %c0_55 = arith.constant 0 : index
    %c0_56 = arith.constant 0 : index
    %122 = vector.load %arg12[%c0_55, %c0_56] : memref<1x32xf32, #tpu.memory_space<vmem>>, vector<1x32xf32>
    %cst_57 = arith.constant dense<0.000000e+00> : vector<8xf32>
    %123 = vector.multi_reduction <add>, %120, %cst_57 [1] : vector<8x32xf32> to vector<8xf32>
    %124 = vector.shape_cast %123 : vector<8xf32> to vector<8x1xf32>
    %cst_58 = arith.constant 3.200000e+01 : f32
    %125 = vector.broadcast %cst_58 : f32 to vector<8x1xf32>
    %126 = arith.divf %124, %125 : vector<8x1xf32>
    %127 = vector.broadcast %126 : vector<8x1xf32> to vector<8x32xf32>
    %128 = arith.subf %120, %127 : vector<8x32xf32>
    %129 = arith.mulf %128, %128 : vector<8x32xf32>
    %cst_59 = arith.constant dense<0.000000e+00> : vector<8xf32>
    %130 = vector.multi_reduction <add>, %129, %cst_59 [1] : vector<8x32xf32> to vector<8xf32>
    %131 = vector.shape_cast %130 : vector<8xf32> to vector<8x1xf32>
    %cst_60 = arith.constant 3.200000e+01 : f32
    %132 = vector.broadcast %cst_60 : f32 to vector<8x1xf32>
    %133 = arith.divf %131, %132 : vector<8x1xf32>
    %134 = vector.broadcast %126 : vector<8x1xf32> to vector<8x32xf32>
    %135 = arith.subf %120, %134 : vector<8x32xf32>
    %cst_61 = arith.constant 9.99999974E-6 : f32
    %136 = vector.broadcast %cst_61 : f32 to vector<8x1xf32>
    %137 = arith.addf %133, %136 : vector<8x1xf32>
    %138 = math.rsqrt %137 : vector<8x1xf32>
    %139 = vector.broadcast %138 : vector<8x1xf32> to vector<8x32xf32>
    %140 = arith.mulf %135, %139 : vector<8x32xf32>
    %141 = vector.broadcast %121 : vector<1x32xf32> to vector<8x32xf32>
    %142 = arith.mulf %140, %141 : vector<8x32xf32>
    %143 = vector.broadcast %122 : vector<1x32xf32> to vector<8x32xf32>
    %144 = arith.addf %142, %143 : vector<8x32xf32>
    %145 = vector.shape_cast %144 : vector<8x32xf32> to vector<1x8x32xf32>
    %c0_62 = arith.constant 0 : index
    %c0_63 = arith.constant 0 : index
    %c0_64 = arith.constant 0 : index
    %146 = vector.load %arg13[%c0_62, %c0_63, %c0_64] : memref<1x8x32xf32, #tpu.memory_space<vmem>>, vector<1x8x32xf32>
    tpu.vector_store %arg13[%c0_62, %c0_63, %c0_64], %145 {strides = array<i32>} : memref<1x8x32xf32, #tpu.memory_space<vmem>>, vector<1x8x32xf32>,
    return
  }
  func.func @transform_0(%arg0: i32) -> (i32, i32, i32) {
    %c0_i32 = arith.constant 0 : i32
    %c0_i32_0 = arith.constant 0 : i32
    %c0_i32_1 = arith.constant 0 : i32
    return %arg0, %c0_i32, %c0_i32_0 : i32, i32, i32
  }
  func.func @transform_1(%arg0: i32) -> (i32, i32, i32) {
    %c0_i32 = arith.constant 0 : i32
    %c0_i32_0 = arith.constant 0 : i32
    %c0_i32_1 = arith.constant 0 : i32
    return %arg0, %c0_i32, %c0_i32_0 : i32, i32, i32
  }
  func.func @transform_2(%arg0: i32) -> (i32, i32) {
    %c0_i32 = arith.constant 0 : i32
    %c0_i32_0 = arith.constant 0 : i32
    %c0_i32_1 = arith.constant 0 : i32
    return %c0_i32, %c0_i32_0 : i32, i32
  }
  func.func @transform_3(%arg0: i32) -> (i32, i32) {
    %c0_i32 = arith.constant 0 : i32
    %c0_i32_0 = arith.constant 0 : i32
    %c0_i32_1 = arith.constant 0 : i32
    return %c0_i32, %c0_i32_0 : i32, i32
  }
  func.func @transform_4(%arg0: i32) -> (i32, i32) {
    %c0_i32 = arith.constant 0 : i32
    %c0_i32_0 = arith.constant 0 : i32
    %c0_i32_1 = arith.constant 0 : i32
    return %c0_i32, %c0_i32_0 : i32, i32
  }
  func.func @transform_5(%arg0: i32) -> (i32, i32) {
    %c0_i32 = arith.constant 0 : i32
    %c0_i32_0 = arith.constant 0 : i32
    %c0_i32_1 = arith.constant 0 : i32
    return %c0_i32, %c0_i32_0 : i32, i32
  }
  func.func @transform_6(%arg0: i32) -> (i32, i32) {
    %c0_i32 = arith.constant 0 : i32
    %c0_i32_0 = arith.constant 0 : i32
    %c0_i32_1 = arith.constant 0 : i32
    return %c0_i32, %c0_i32_0 : i32, i32
  }
  func.func @transform_7(%arg0: i32) -> (i32, i32) {
    %c0_i32 = arith.constant 0 : i32
    %c0_i32_0 = arith.constant 0 : i32
    %c0_i32_1 = arith.constant 0 : i32
    return %c0_i32, %c0_i32_0 : i32, i32
  }
  func.func @transform_8(%arg0: i32) -> (i32, i32) {
    %c0_i32 = arith.constant 0 : i32
    %c0_i32_0 = arith.constant 0 : i32
    %c0_i32_1 = arith.constant 0 : i32
    return %c0_i32, %c0_i32_0 : i32, i32
  }
  func.func @transform_9(%arg0: i32) -> (i32, i32) {
    %c0_i32 = arith.constant 0 : i32
    %c0_i32_0 = arith.constant 0 : i32
    %c0_i32_1 = arith.constant 0 : i32
    return %c0_i32, %c0_i32_0 : i32, i32
  }
  func.func @transform_10(%arg0: i32) -> (i32, i32) {
    %c0_i32 = arith.constant 0 : i32
    %c0_i32_0 = arith.constant 0 : i32
    %c0_i32_1 = arith.constant 0 : i32
    return %c0_i32, %c0_i32_0 : i32, i32
  }
  func.func @transform_11(%arg0: i32) -> (i32, i32) {
    %c0_i32 = arith.constant 0 : i32
    %c0_i32_0 = arith.constant 0 : i32
    %c0_i32_1 = arith.constant 0 : i32
    return %c0_i32, %c0_i32_0 : i32, i32
  }
  func.func @transform_12(%arg0: i32) -> (i32, i32, i32) {
    %c0_i32 = arith.constant 0 : i32
    %c0_i32_0 = arith.constant 0 : i32
    %c0_i32_1 = arith.constant 0 : i32
    return %arg0, %c0_i32, %c0_i32_0 : i32, i32, i32
  }
}

module attributes {stable_mosaic.version = 11 : i64} {
  func.func @mab_kernel(%arg0: i32, %arg1: memref<1x8x32xf32, #tpu.memory_space<vmem>>, %arg2: memref<1x8x32xf32, #tpu.memory_space<vmem>>, %arg3: memref<32x32xf32, #tpu.memory_space<vmem>>, %arg4: memref<32x32xf32, #tpu.memory_space<vmem>>, %arg5: memref<32x32xf32, #tpu.memory_space<vmem>>, %arg6: memref<32x32xf32, #tpu.memory_space<vmem>>, %arg7: memref<1x32xf32, #tpu.memory_space<vmem>>, %arg8: memref<1x32xf32, #tpu.memory_space<vmem>>, %arg9: memref<32x64xf32, #tpu.memory_space<vmem>>, %arg10: memref<64x32xf32, #tpu.memory_space<vmem>>, %arg11: memref<1x32xf32, #tpu.memory_space<vmem>>, %arg12: memref<1x32xf32, #tpu.memory_space<vmem>>, %arg13: memref<1x8x32xf32, #tpu.memory_space<vmem>>) attributes {dimension_semantics = [#tpu.dimension_semantics<parallel>], iteration_bounds = array<i64: 2>, scalar_prefetch = 0 : i64, scratch_operands = 0 : i64, tpu.core_type = #tpu.core_type<tc>, window_params = [{transform_indices = @transform_0, window_bounds = array<i64: 1, 8, 32>}, {transform_indices = @transform_1, window_bounds = array<i64: 1, 8, 32>}, {pipeline_mode = #tpu.pipeline_mode<synchronous>, transform_indices = @transform_2, window_bounds = array<i64: 32, 32>}, {pipeline_mode = #tpu.pipeline_mode<synchronous>, transform_indices = @transform_3, window_bounds = array<i64: 32, 32>}, {pipeline_mode = #tpu.pipeline_mode<synchronous>, transform_indices = @transform_4, window_bounds = array<i64: 32, 32>}, {pipeline_mode = #tpu.pipeline_mode<synchronous>, transform_indices = @transform_5, window_bounds = array<i64: 32, 32>}, {pipeline_mode = #tpu.pipeline_mode<synchronous>, transform_indices = @transform_6, window_bounds = array<i64: 1, 32>}, {pipeline_mode = #tpu.pipeline_mode<synchronous>, transform_indices = @transform_7, window_bounds = array<i64: 1, 32>}, {pipeline_mode = #tpu.pipeline_mode<synchronous>, transform_indices = @transform_8, window_bounds = array<i64: 32, 64>}, {pipeline_mode = #tpu.pipeline_mode<synchronous>, transform_indices = @transform_9, window_bounds = array<i64: 64, 32>}, {pipeline_mode = #tpu.pipeline_mode<synchronous>, transform_indices = @transform_10, window_bounds = array<i64: 1, 32>}, {pipeline_mode = #tpu.pipeline_mode<synchronous>, transform_indices = @transform_11, window_bounds = array<i64: 1, 32>}, {transform_indices = @transform_12, window_bounds = array<i64: 1, 8, 32>}]} {
    %c0 = arith.constant 0 : index
    %c0_0 = arith.constant 0 : index
    %c0_1 = arith.constant 0 : index
    %0 = vector.load %arg1[%c0, %c0_0, %c0_1] : memref<1x8x32xf32, #tpu.memory_space<vmem>>, vector<1x8x32xf32>
    %1 = vector.shape_cast %0 : vector<1x8x32xf32> to vector<8x32xf32>
    %c0_2 = arith.constant 0 : index
    %c0_3 = arith.constant 0 : index
    %c0_4 = arith.constant 0 : index
    %2 = vector.load %arg2[%c0_2, %c0_3, %c0_4] : memref<1x8x32xf32, #tpu.memory_space<vmem>>, vector<1x8x32xf32>
    %3 = vector.shape_cast %2 : vector<1x8x32xf32> to vector<8x32xf32>
    %c0_5 = arith.constant 0 : index
    %c0_6 = arith.constant 0 : index
    %4 = vector.load %arg3[%c0_5, %c0_6] : memref<32x32xf32, #tpu.memory_space<vmem>>, vector<32x32xf32>
    %cst = arith.constant dense<0.000000e+00> : vector<8x32xf32>
    %5 = tpu.matmul %1, %4, %cst {dimension_numbers = #tpu.dot_dimension_numbers<[1], [0], [0], [1], [0, 0, 1, 1], [], []>} : vector<8x32xf32>, vector<32x32xf32>, vector<8x32xf32> -> vector<8x32xf32>
    %c0_7 = arith.constant 0 : index
    %c0_8 = arith.constant 0 : index
    %6 = vector.load %arg4[%c0_7, %c0_8] : memref<32x32xf32, #tpu.memory_space<vmem>>, vector<32x32xf32>
    %cst_9 = arith.constant dense<0.000000e+00> : vector<8x32xf32>
    %7 = tpu.matmul %3, %6, %cst_9 {dimension_numbers = #tpu.dot_dimension_numbers<[1], [0], [0], [1], [0, 0, 1, 1], [], []>} : vector<8x32xf32>, vector<32x32xf32>, vector<8x32xf32> -> vector<8x32xf32>
    %c0_10 = arith.constant 0 : index
    %c0_11 = arith.constant 0 : index
    %8 = vector.load %arg5[%c0_10, %c0_11] : memref<32x32xf32, #tpu.memory_space<vmem>>, vector<32x32xf32>
    %cst_12 = arith.constant dense<0.000000e+00> : vector<8x32xf32>
    %9 = tpu.matmul %3, %8, %cst_12 {dimension_numbers = #tpu.dot_dimension_numbers<[1], [0], [0], [1], [0, 0, 1, 1], [], []>} : vector<8x32xf32>, vector<32x32xf32>, vector<8x32xf32> -> vector<8x32xf32>
    %cst_13 = arith.constant 0.353553385 : f32
    %10 = vector.broadcast %cst_13 : f32 to vector<8x32xf32>
    %11 = arith.mulf %5, %10 : vector<8x32xf32>
    %12 = vector.shape_cast %11 : vector<8x32xf32> to vector<1x8x32xf32>
    %13 = vector.shape_cast %7 : vector<8x32xf32> to vector<1x8x32xf32>
    %14 = vector.shape_cast %9 : vector<8x32xf32> to vector<1x8x32xf32>
    %c0_14 = arith.constant 0 : index
    %c0_15 = arith.constant 0 : index
    %15 = vector.load %arg6[%c0_14, %c0_15] : memref<32x32xf32, #tpu.memory_space<vmem>>, vector<32x32xf32>
    %cst_16 = arith.constant 0.000000e+00 : f32
    %16 = vector.broadcast %cst_16 : f32 to vector<8x32xf32>
    %17 = vector.extract_strided_slice %12 {offsets = [0, 0, 0], sizes = [1, 8, 8], strides = [1, 1, 1]} : vector<1x8x32xf32> to vector<1x8x8xf32>
    %18 = vector.extract_strided_slice %13 {offsets = [0, 0, 0], sizes = [1, 8, 8], strides = [1, 1, 1]} : vector<1x8x32xf32> to vector<1x8x8xf32>
    %19 = vector.extract_strided_slice %14 {offsets = [0, 0, 0], sizes = [1, 8, 8], strides = [1, 1, 1]} : vector<1x8x32xf32> to vector<1x8x8xf32>
    "tpu.trace_start"() <{level = 10 : i32, message = "bqd,bkd->bqk"}> : () -> ()
    %cst_17 = arith.constant dense<0.000000e+00> : vector<1x8x8xf32>
    %20 = tpu.matmul %17, %18, %cst_17 {dimension_numbers = #tpu.dot_dimension_numbers<[2], [2], [1], [1], [0, 0, 0, 1, 1, 1], [0], [0]>} : vector<1x8x8xf32>, vector<1x8x8xf32>, vector<1x8x8xf32> -> vector<1x8x8xf32>
    "tpu.trace_stop"() : () -> ()
    %cst_18 = arith.constant dense<0xFF800000> : vector<1x8xf32>
    %21 = vector.multi_reduction <maximumf>, %20, %cst_18 [2] : vector<1x8x8xf32> to vector<1x8xf32>
    %22 = vector.shape_cast %21 : vector<1x8xf32> to vector<1x8x1xf32>
    %23 = vector.broadcast %22 : vector<1x8x1xf32> to vector<1x8x8xf32>
    %24 = arith.subf %20, %23 : vector<1x8x8xf32>
    %25 = math.exp %24 : vector<1x8x8xf32>
    %cst_19 = arith.constant dense<0.000000e+00> : vector<1x8xf32>
    %26 = vector.multi_reduction <add>, %25, %cst_19 [2] : vector<1x8x8xf32> to vector<1x8xf32>
    %27 = vector.shape_cast %26 : vector<1x8xf32> to vector<1x8x1xf32>
    %28 = vector.broadcast %27 : vector<1x8x1xf32> to vector<1x8x8xf32>
    %29 = arith.divf %25, %28 : vector<1x8x8xf32>
    "tpu.trace_start"() <{level = 10 : i32, message = "bqk,bkd->bqd"}> : () -> ()
    %cst_20 = arith.constant dense<0.000000e+00> : vector<1x8x8xf32>
    %30 = tpu.matmul %29, %19, %cst_20 {dimension_numbers = #tpu.dot_dimension_numbers<[2], [1], [1], [2], [0, 0, 0, 1, 1, 2], [0], [0]>} : vector<1x8x8xf32>, vector<1x8x8xf32>, vector<1x8x8xf32> -> vector<1x8x8xf32>
    "tpu.trace_stop"() : () -> ()
    %31 = vector.shape_cast %30 : vector<1x8x8xf32> to vector<8x8xf32>
    %32 = vector.extract_strided_slice %15 {offsets = [0, 0], sizes = [8, 32], strides = [1, 1]} : vector<32x32xf32> to vector<8x32xf32>
    %cst_21 = arith.constant dense<0.000000e+00> : vector<8x32xf32>
    %33 = tpu.matmul %31, %32, %cst_21 {dimension_numbers = #tpu.dot_dimension_numbers<[1], [0], [0], [1], [0, 0, 1, 1], [], []>} : vector<8x8xf32>, vector<8x32xf32>, vector<8x32xf32> -> vector<8x32xf32>
    %34 = arith.addf %16, %33 : vector<8x32xf32>
    %35 = vector.extract_strided_slice %12 {offsets = [0, 0, 8], sizes = [1, 8, 8], strides = [1, 1, 1]} : vector<1x8x32xf32> to vector<1x8x8xf32>
    %36 = vector.extract_strided_slice %13 {offsets = [0, 0, 8], sizes = [1, 8, 8], strides = [1, 1, 1]} : vector<1x8x32xf32> to vector<1x8x8xf32>
    %37 = vector.extract_strided_slice %14 {offsets = [0, 0, 8], sizes = [1, 8, 8], strides = [1, 1, 1]} : vector<1x8x32xf32> to vector<1x8x8xf32>
    "tpu.trace_start"() <{level = 10 : i32, message = "bqd,bkd->bqk"}> : () -> ()
    %cst_22 = arith.constant dense<0.000000e+00> : vector<1x8x8xf32>
    %38 = tpu.matmul %35, %36, %cst_22 {dimension_numbers = #tpu.dot_dimension_numbers<[2], [2], [1], [1], [0, 0, 0, 1, 1, 1], [0], [0]>} : vector<1x8x8xf32>, vector<1x8x8xf32>, vector<1x8x8xf32> -> vector<1x8x8xf32>
    "tpu.trace_stop"() : () -> ()
    %cst_23 = arith.constant dense<0xFF800000> : vector<1x8xf32>
    %39 = vector.multi_reduction <maximumf>, %38, %cst_23 [2] : vector<1x8x8xf32> to vector<1x8xf32>
    %40 = vector.shape_cast %39 : vector<1x8xf32> to vector<1x8x1xf32>
    %41 = vector.broadcast %40 : vector<1x8x1xf32> to vector<1x8x8xf32>
    %42 = arith.subf %38, %41 : vector<1x8x8xf32>
    %43 = math.exp %42 : vector<1x8x8xf32>
    %cst_24 = arith.constant dense<0.000000e+00> : vector<1x8xf32>
    %44 = vector.multi_reduction <add>, %43, %cst_24 [2] : vector<1x8x8xf32> to vector<1x8xf32>
    %45 = vector.shape_cast %44 : vector<1x8xf32> to vector<1x8x1xf32>
    %46 = vector.broadcast %45 : vector<1x8x1xf32> to vector<1x8x8xf32>
    %47 = arith.divf %43, %46 : vector<1x8x8xf32>
    "tpu.trace_start"() <{level = 10 : i32, message = "bqk,bkd->bqd"}> : () -> ()
    %cst_25 = arith.constant dense<0.000000e+00> : vector<1x8x8xf32>
    %48 = tpu.matmul %47, %37, %cst_25 {dimension_numbers = #tpu.dot_dimension_numbers<[2], [1], [1], [2], [0, 0, 0, 1, 1, 2], [0], [0]>} : vector<1x8x8xf32>, vector<1x8x8xf32>, vector<1x8x8xf32> -> vector<1x8x8xf32>
    "tpu.trace_stop"() : () -> ()
    %49 = vector.shape_cast %48 : vector<1x8x8xf32> to vector<8x8xf32>
    %50 = vector.extract_strided_slice %15 {offsets = [8, 0], sizes = [8, 32], strides = [1, 1]} : vector<32x32xf32> to vector<8x32xf32>
    %cst_26 = arith.constant dense<0.000000e+00> : vector<8x32xf32>
    %51 = tpu.matmul %49, %50, %cst_26 {dimension_numbers = #tpu.dot_dimension_numbers<[1], [0], [0], [1], [0, 0, 1, 1], [], []>} : vector<8x8xf32>, vector<8x32xf32>, vector<8x32xf32> -> vector<8x32xf32>
    %52 = arith.addf %34, %51 : vector<8x32xf32>
    %53 = vector.extract_strided_slice %12 {offsets = [0, 0, 16], sizes = [1, 8, 8], strides = [1, 1, 1]} : vector<1x8x32xf32> to vector<1x8x8xf32>
    %54 = vector.extract_strided_slice %13 {offsets = [0, 0, 16], sizes = [1, 8, 8], strides = [1, 1, 1]} : vector<1x8x32xf32> to vector<1x8x8xf32>
    %55 = vector.extract_strided_slice %14 {offsets = [0, 0, 16], sizes = [1, 8, 8], strides = [1, 1, 1]} : vector<1x8x32xf32> to vector<1x8x8xf32>
    "tpu.trace_start"() <{level = 10 : i32, message = "bqd,bkd->bqk"}> : () -> ()
    %cst_27 = arith.constant dense<0.000000e+00> : vector<1x8x8xf32>
    %56 = tpu.matmul %53, %54, %cst_27 {dimension_numbers = #tpu.dot_dimension_numbers<[2], [2], [1], [1], [0, 0, 0, 1, 1, 1], [0], [0]>} : vector<1x8x8xf32>, vector<1x8x8xf32>, vector<1x8x8xf32> -> vector<1x8x8xf32>
    "tpu.trace_stop"() : () -> ()
    %cst_28 = arith.constant dense<0xFF800000> : vector<1x8xf32>
    %57 = vector.multi_reduction <maximumf>, %56, %cst_28 [2] : vector<1x8x8xf32> to vector<1x8xf32>
    %58 = vector.shape_cast %57 : vector<1x8xf32> to vector<1x8x1xf32>
    %59 = vector.broadcast %58 : vector<1x8x1xf32> to vector<1x8x8xf32>
    %60 = arith.subf %56, %59 : vector<1x8x8xf32>
    %61 = math.exp %60 : vector<1x8x8xf32>
    %cst_29 = arith.constant dense<0.000000e+00> : vector<1x8xf32>
    %62 = vector.multi_reduction <add>, %61, %cst_29 [2] : vector<1x8x8xf32> to vector<1x8xf32>
    %63 = vector.shape_cast %62 : vector<1x8xf32> to vector<1x8x1xf32>
    %64 = vector.broadcast %63 : vector<1x8x1xf32> to vector<1x8x8xf32>
    %65 = arith.divf %61, %64 : vector<1x8x8xf32>
    "tpu.trace_start"() <{level = 10 : i32, message = "bqk,bkd->bqd"}> : () -> ()
    %cst_30 = arith.constant dense<0.000000e+00> : vector<1x8x8xf32>
    %66 = tpu.matmul %65, %55, %cst_30 {dimension_numbers = #tpu.dot_dimension_numbers<[2], [1], [1], [2], [0, 0, 0, 1, 1, 2], [0], [0]>} : vector<1x8x8xf32>, vector<1x8x8xf32>, vector<1x8x8xf32> -> vector<1x8x8xf32>
    "tpu.trace_stop"() : () -> ()
    %67 = vector.shape_cast %66 : vector<1x8x8xf32> to vector<8x8xf32>
    %68 = vector.extract_strided_slice %15 {offsets = [16, 0], sizes = [8, 32], strides = [1, 1]} : vector<32x32xf32> to vector<8x32xf32>
    %cst_31 = arith.constant dense<0.000000e+00> : vector<8x32xf32>
    %69 = tpu.matmul %67, %68, %cst_31 {dimension_numbers = #tpu.dot_dimension_numbers<[1], [0], [0], [1], [0, 0, 1, 1], [], []>} : vector<8x8xf32>, vector<8x32xf32>, vector<8x32xf32> -> vector<8x32xf32>
    %70 = arith.addf %52, %69 : vector<8x32xf32>
    %71 = vector.extract_strided_slice %12 {offsets = [0, 0, 24], sizes = [1, 8, 8], strides = [1, 1, 1]} : vector<1x8x32xf32> to vector<1x8x8xf32>
    %72 = vector.extract_strided_slice %13 {offsets = [0, 0, 24], sizes = [1, 8, 8], strides = [1, 1, 1]} : vector<1x8x32xf32> to vector<1x8x8xf32>
    %73 = vector.extract_strided_slice %14 {offsets = [0, 0, 24], sizes = [1, 8, 8], strides = [1, 1, 1]} : vector<1x8x32xf32> to vector<1x8x8xf32>
    "tpu.trace_start"() <{level = 10 : i32, message = "bqd,bkd->bqk"}> : () -> ()
    %cst_32 = arith.constant dense<0.000000e+00> : vector<1x8x8xf32>
    %74 = tpu.matmul %71, %72, %cst_32 {dimension_numbers = #tpu.dot_dimension_numbers<[2], [2], [1], [1], [0, 0, 0, 1, 1, 1], [0], [0]>} : vector<1x8x8xf32>, vector<1x8x8xf32>, vector<1x8x8xf32> -> vector<1x8x8xf32>
    "tpu.trace_stop"() : () -> ()
    %cst_33 = arith.constant dense<0xFF800000> : vector<1x8xf32>
    %75 = vector.multi_reduction <maximumf>, %74, %cst_33 [2] : vector<1x8x8xf32> to vector<1x8xf32>
    %76 = vector.shape_cast %75 : vector<1x8xf32> to vector<1x8x1xf32>
    %77 = vector.broadcast %76 : vector<1x8x1xf32> to vector<1x8x8xf32>
    %78 = arith.subf %74, %77 : vector<1x8x8xf32>
    %79 = math.exp %78 : vector<1x8x8xf32>
    %cst_34 = arith.constant dense<0.000000e+00> : vector<1x8xf32>
    %80 = vector.multi_reduction <add>, %79, %cst_34 [2] : vector<1x8x8xf32> to vector<1x8xf32>
    %81 = vector.shape_cast %80 : vector<1x8xf32> to vector<1x8x1xf32>
    %82 = vector.broadcast %81 : vector<1x8x1xf32> to vector<1x8x8xf32>
    %83 = arith.divf %79, %82 : vector<1x8x8xf32>
    "tpu.trace_start"() <{level = 10 : i32, message = "bqk,bkd->bqd"}> : () -> ()
    %cst_35 = arith.constant dense<0.000000e+00> : vector<1x8x8xf32>
    %84 = tpu.matmul %83, %73, %cst_35 {dimension_numbers = #tpu.dot_dimension_numbers<[2], [1], [1], [2], [0, 0, 0, 1, 1, 2], [0], [0]>} : vector<1x8x8xf32>, vector<1x8x8xf32>, vector<1x8x8xf32> -> vector<1x8x8xf32>
    "tpu.trace_stop"() : () -> ()
    %85 = vector.shape_cast %84 : vector<1x8x8xf32> to vector<8x8xf32>
    %86 = vector.extract_strided_slice %15 {offsets = [24, 0], sizes = [8, 32], strides = [1, 1]} : vector<32x32xf32> to vector<8x32xf32>
    %cst_36 = arith.constant dense<0.000000e+00> : vector<8x32xf32>
    %87 = tpu.matmul %85, %86, %cst_36 {dimension_numbers = #tpu.dot_dimension_numbers<[1], [0], [0], [1], [0, 0, 1, 1], [], []>} : vector<8x8xf32>, vector<8x32xf32>, vector<8x32xf32> -> vector<8x32xf32>
    %88 = arith.addf %70, %87 : vector<8x32xf32>
    %89 = arith.addf %88, %5 : vector<8x32xf32>
    %c0_37 = arith.constant 0 : index
    %c0_38 = arith.constant 0 : index
    %90 = vector.load %arg7[%c0_37, %c0_38] : memref<1x32xf32, #tpu.memory_space<vmem>>, vector<1x32xf32>
    %c0_39 = arith.constant 0 : index
    %c0_40 = arith.constant 0 : index
    %91 = vector.load %arg8[%c0_39, %c0_40] : memref<1x32xf32, #tpu.memory_space<vmem>>, vector<1x32xf32>
    %cst_41 = arith.constant dense<0.000000e+00> : vector<8xf32>
    %92 = vector.multi_reduction <add>, %89, %cst_41 [1] : vector<8x32xf32> to vector<8xf32>
    %93 = vector.shape_cast %92 : vector<8xf32> to vector<8x1xf32>
    %cst_42 = arith.constant 3.200000e+01 : f32
    %94 = vector.broadcast %cst_42 : f32 to vector<8x1xf32>
    %95 = arith.divf %93, %94 : vector<8x1xf32>
    %96 = vector.broadcast %95 : vector<8x1xf32> to vector<8x32xf32>
    %97 = arith.subf %89, %96 : vector<8x32xf32>
    %98 = arith.mulf %97, %97 : vector<8x32xf32>
    %cst_43 = arith.constant dense<0.000000e+00> : vector<8xf32>
    %99 = vector.multi_reduction <add>, %98, %cst_43 [1] : vector<8x32xf32> to vector<8xf32>
    %100 = vector.shape_cast %99 : vector<8xf32> to vector<8x1xf32>
    %cst_44 = arith.constant 3.200000e+01 : f32
    %101 = vector.broadcast %cst_44 : f32 to vector<8x1xf32>
    %102 = arith.divf %100, %101 : vector<8x1xf32>
    %103 = vector.broadcast %95 : vector<8x1xf32> to vector<8x32xf32>
    %104 = arith.subf %89, %103 : vector<8x32xf32>
    %cst_45 = arith.constant 9.99999974E-6 : f32
    %105 = vector.broadcast %cst_45 : f32 to vector<8x1xf32>
    %106 = arith.addf %102, %105 : vector<8x1xf32>
    %107 = math.rsqrt %106 : vector<8x1xf32>
    %108 = vector.broadcast %107 : vector<8x1xf32> to vector<8x32xf32>
    %109 = arith.mulf %104, %108 : vector<8x32xf32>
    %110 = vector.broadcast %90 : vector<1x32xf32> to vector<8x32xf32>
    %111 = arith.mulf %109, %110 : vector<8x32xf32>
    %112 = vector.broadcast %91 : vector<1x32xf32> to vector<8x32xf32>
    %113 = arith.addf %111, %112 : vector<8x32xf32>
    %c0_46 = arith.constant 0 : index
    %c0_47 = arith.constant 0 : index
    %114 = vector.load %arg9[%c0_46, %c0_47] : memref<32x64xf32, #tpu.memory_space<vmem>>, vector<32x64xf32>
    %cst_48 = arith.constant dense<0.000000e+00> : vector<8x64xf32>
    %115 = tpu.matmul %113, %114, %cst_48 {dimension_numbers = #tpu.dot_dimension_numbers<[1], [0], [0], [1], [0, 0, 1, 1], [], []>} : vector<8x32xf32>, vector<32x64xf32>, vector<8x64xf32> -> vector<8x64xf32>
    %cst_49 = arith.constant 0.000000e+00 : f32
    %116 = vector.broadcast %cst_49 : f32 to vector<8x64xf32>
    %117 = arith.maximumf %115, %116 : vector<8x64xf32>
    %c0_50 = arith.constant 0 : index
    %c0_51 = arith.constant 0 : index
    %118 = vector.load %arg10[%c0_50, %c0_51] : memref<64x32xf32, #tpu.memory_space<vmem>>, vector<64x32xf32>
    %cst_52 = arith.constant dense<0.000000e+00> : vector<8x32xf32>
    %119 = tpu.matmul %117, %118, %cst_52 {dimension_numbers = #tpu.dot_dimension_numbers<[1], [0], [0], [1], [0, 0, 1, 1], [], []>} : vector<8x64xf32>, vector<64x32xf32>, vector<8x32xf32> -> vector<8x32xf32>
    %120 = arith.addf %119, %113 : vector<8x32xf32>
    %c0_53 = arith.constant 0 : index
    %c0_54 = arith.constant 0 : index
    %121 = vector.load %arg11[%c0_53, %c0_54] : memref<1x32xf32, #tpu.memory_space<vmem>>, vector<1x32xf32>
    %c0_55 = arith.constant 0 : index
    %c0_56 = arith.constant 0 : index
    %122 = vector.load %arg12[%c0_55, %c0_56] : memref<1x32xf32, #tpu.memory_space<vmem>>, vector<1x32xf32>
    %cst_57 = arith.constant dense<0.000000e+00> : vector<8xf32>
    %123 = vector.multi_reduction <add>, %120, %cst_57 [1] : vector<8x32xf32> to vector<8xf32>
    %124 = vector.shape_cast %123 : vector<8xf32> to vector<8x1xf32>
    %cst_58 = arith.constant 3.200000e+01 : f32
    %125 = vector.broadcast %cst_58 : f32 to vector<8x1xf32>
    %126 = arith.divf %124, %125 : vector<8x1xf32>
    %127 = vector.broadcast %126 : vector<8x1xf32> to vector<8x32xf32>
    %128 = arith.subf %120, %127 : vector<8x32xf32>
    %129 = arith.mulf %128, %128 : vector<8x32xf32>
    %cst_59 = arith.constant dense<0.000000e+00> : vector<8xf32>
    %130 = vector.multi_reduction <add>, %129, %cst_59 [1] : vector<8x32xf32> to vector<8xf32>
    %131 = vector.shape_cast %130 : vector<8xf32> to vector<8x1xf32>
    %cst_60 = arith.constant 3.200000e+01 : f32
    %132 = vector.broadcast %cst_60 : f32 to vector<8x1xf32>
    %133 = arith.divf %131, %132 : vector<8x1xf32>
    %134 = vector.broadcast %126 : vector<8x1xf32> to vector<8x32xf32>
    %135 = arith.subf %120, %134 : vector<8x32xf32>
    %cst_61 = arith.constant 9.99999974E-6 : f32
    %136 = vector.broadcast %cst_61 : f32 to vector<8x1xf32>
    %137 = arith.addf %133, %136 : vector<8x1xf32>
    %138 = math.rsqrt %137 : vector<8x1xf32>
    %139 = vector.broadcast %138 : vector<8x1xf32> to vector<8x32xf32>
    %140 = arith.mulf %135, %139 : vector<8x32xf32>
    %141 = vector.broadcast %121 : vector<1x32xf32> to vector<8x32xf32>
    %142 = arith.mulf %140, %141 : vector<8x32xf32>
    %143 = vector.broadcast %122 : vector<1x32xf32> to vector<8x32xf32>
    %144 = arith.addf %142, %143 : vector<8x32xf32>
    %145 = vector.shape_cast %144 : vector<8x32xf32> to vector<1x8x32xf32>
    %c0_62 = arith.constant 0 : index
    %c0_63 = arith.constant 0 : index
    %c0_64 = arith.constant 0 : index
    %146 = vector.load %arg13[%c0_62, %c0_63, %c0_64] : memref<1x8x32xf32, #tpu.memory_space<vmem>>, vector<1x8x32xf32>
    tpu.vector_store %arg13[%c0_62, %c0_63, %c0_64], %145 {strides = array<i32>} : memref<1x8x32xf32, #tpu.memory_space<vmem>>, vector<1x8x32xf32>,
    return
  }
  func.func @transform_0(%arg0: i32) -> (i32, i32, i32) {
    %c0_i32 = arith.constant 0 : i32
    %c0_i32_0 = arith.constant 0 : i32
    %c0_i32_1 = arith.constant 0 : i32
    return %arg0, %c0_i32, %c0_i32_0 : i32, i32, i32
  }
  func.func @transform_1(%arg0: i32) -> (i32, i32, i32) {
    %c0_i32 = arith.constant 0 : i32
    %c0_i32_0 = arith.constant 0 : i32
    %c0_i32_1 = arith.constant 0 : i32
    return %arg0, %c0_i32, %c0_i32_0 : i32, i32, i32
  }
  func.func @transform_2(%arg0: i32) -> (i32, i32) {
    %c0_i32 = arith.constant 0 : i32
    %c0_i32_0 = arith.constant 0 : i32
    %c0_i32_1 = arith.constant 0 : i32
    return %c0_i32, %c0_i32_0 : i32, i32
  }
  func.func @transform_3(%arg0: i32) -> (i32, i32) {
    %c0_i32 = arith.constant 0 : i32
    %c0_i32_0 = arith.constant 0 : i32
    %c0_i32_1 = arith.constant 0 : i32
    return %c0_i32, %c0_i32_0 : i32, i32
  }
  func.func @transform_4(%arg0: i32) -> (i32, i32) {
    %c0_i32 = arith.constant 0 : i32
    %c0_i32_0 = arith.constant 0 : i32
    %c0_i32_1 = arith.constant 0 : i32
    return %c0_i32, %c0_i32_0 : i32, i32
  }
  func.func @transform_5(%arg0: i32) -> (i32, i32) {
    %c0_i32 = arith.constant 0 : i32
    %c0_i32_0 = arith.constant 0 : i32
    %c0_i32_1 = arith.constant 0 : i32
    return %c0_i32, %c0_i32_0 : i32, i32
  }
  func.func @transform_6(%arg0: i32) -> (i32, i32) {
    %c0_i32 = arith.constant 0 : i32
    %c0_i32_0 = arith.constant 0 : i32
    %c0_i32_1 = arith.constant 0 : i32
    return %c0_i32, %c0_i32_0 : i32, i32
  }
  func.func @transform_7(%arg0: i32) -> (i32, i32) {
    %c0_i32 = arith.constant 0 : i32
    %c0_i32_0 = arith.constant 0 : i32
    %c0_i32_1 = arith.constant 0 : i32
    return %c0_i32, %c0_i32_0 : i32, i32
  }
  func.func @transform_8(%arg0: i32) -> (i32, i32) {
    %c0_i32 = arith.constant 0 : i32
    %c0_i32_0 = arith.constant 0 : i32
    %c0_i32_1 = arith.constant 0 : i32
    return %c0_i32, %c0_i32_0 : i32, i32
  }
  func.func @transform_9(%arg0: i32) -> (i32, i32) {
    %c0_i32 = arith.constant 0 : i32
    %c0_i32_0 = arith.constant 0 : i32
    %c0_i32_1 = arith.constant 0 : i32
    return %c0_i32, %c0_i32_0 : i32, i32
  }
  func.func @transform_10(%arg0: i32) -> (i32, i32) {
    %c0_i32 = arith.constant 0 : i32
    %c0_i32_0 = arith.constant 0 : i32
    %c0_i32_1 = arith.constant 0 : i32
    return %c0_i32, %c0_i32_0 : i32, i32
  }
  func.func @transform_11(%arg0: i32) -> (i32, i32) {
    %c0_i32 = arith.constant 0 : i32
    %c0_i32_0 = arith.constant 0 : i32
    %c0_i32_1 = arith.constant 0 : i32
    return %c0_i32, %c0_i32_0 : i32, i32
  }
  func.func @transform_12(%arg0: i32) -> (i32, i32, i32) {
    %c0_i32 = arith.constant 0 : i32
    %c0_i32_0 = arith.constant 0 : i32
    %c0_i32_1 = arith.constant 0 : i32
    return %arg0, %c0_i32, %c0_i32_0 : i32, i32, i32
  }
}

</mosaic_0001>

<bundles_post_ra>
// kernel: tpu_custom_call.1
= control target key start
LH: loop header
LB: loop body
LE: loop exit
PB: predicated region body
PF: predicated region fallthrough
CT: control target
= control target key end

     0   :  { %s1988_s0 = inlined_call_operand.hbm [shape: f32[2,8,32], index: 0, kind: input, shape index: {}]   ;;  %s1989_s1 = inlined_call_operand.hbm [shape: f32[2,8,32], index: 1, kind: input, shape index: {}]   ;;  %s1990_s2 = inlined_call_operand.vmem [shape: f32[32,32], index: 2, kind: input, shape index: {}]   ;;  %s1991_s3 = inlined_call_operand.vmem [shape: f32[32,32], index: 3, kind: input, shape index: {}]   ;;  %s1992_s4 = inlined_call_operand.vmem [shape: f32[32,32], index: 4, kind: input, shape index: {}]   ;;  %s1993_s5 = inlined_call_operand.hbm [shape: f32[32,32], index: 5, kind: input, shape index: {}]   ;;  %s1994_s6 = inlined_call_operand.vmem [shape: f32[1,32], index: 6, kind: input, shape index: {}]   ;;  %s1995_s7 = inlined_call_operand.vmem [shape: f32[1,32], index: 7, kind: input, shape index: {}]   ;;  %s1996_s8 = inlined_call_operand.hbm [shape: f32[32,64], index: 8, kind: input, shape index: {}]   ;;  %s1997_s9 = inlined_call_operand.vmem [shape: f32[64,32], index: 9, kind: input, shape index: {}]   ;;  %s1998_s10 = inlined_call_operand.vmem [shape: f32[1,32], index: 10, kind: input, shape index: {}]   ;;  %s1999_s11 = inlined_call_operand.vmem [shape: f32[1,32], index: 11, kind: input, shape index: {}]   ;;  %s2000_s12 = inlined_call_operand.hbm [shape: f32[2,8,32], index: 12, kind: output, shape index: {}]  }
   0x1   :  { %2010 = sst [smem:[#allocation23_spill]] %s1993_s5 }
   0x2   :  { %2011 = sst [smem:[#allocation24_spill]] %s1996_s8 }
   0x3   :  { %2012 = sst [smem:[#allocation25_spill]] %s1999_s11 }
   0x4   :  { %2013 = sst [smem:[#allocation26_spill]] %s2000_s12 }
   0x5   :  { %17 = vsyncpa [#allocation3], 0 }
   0x6   :  { %19 = vsyncpa [#allocation3 + $0x1], 0 }
   0x7   :  { %20 = vsyncpa [#allocation6], 0 }
   0x8   :  { %22 = vsyncpa [#allocation6 + $0x1], 0 }
   0x9   :  { %23 = vsyncpa [#allocation9], 0 }
   0xa   :  { %24 = vsyncpa [#allocation4], 0 }
   0xb   :  { %26 = vsyncpa [#allocation4 + $0x1], 0  ;;  %s1670_s21 = smov 0   ;;  %s1672_s22 = smov 0  }
   0xc   :  { %s1674_s23 = smov 0   ;;  %s1676_s24 = smov 0  }
   0xd LB: > { %2014 = sst [smem:[#allocation16_spill]] %s1583_s21  ;;  %s1694_s28 = sadd.s32 4294967295, %s1595_s24   ;;  %s1595_s24 = sphi %s1676_s24, %s2036_s24   ;;  %s1591_s23 = sphi %s1674_s23, %s2038_s23   ;;  %s1587_s22 = sphi %s1672_s22, %s2040_s22   ;;  %s1583_s21 = sphi %s1670_s21, %s2039_s21  }
   0xe   : > { %2015 = sst [smem:[#allocation17_spill]] %s1591_s23  ;;  %p1254_p0 = scmp.ge.s32.totalorder %s1595_s24, 1 }
   0xf   : > { %2016 = sst [smem:[#allocation18_spill]] %s1595_s24  ;;  %p53_p1 = scmp.eq.s32.totalorder %s1694_s28, 0 }
  0x10   : > { %s2017_s5 = sld [smem:[#allocation23_spill]]  ;;  %p325_p2 = scmp.lt.s32.totalorder %s1595_s24, 3 }
  0x11   : > { %s1597_s30 = smov [#allocation7]   ;;  %s2019_s8 = sld [smem:[#allocation24_spill]] }
  0x12   : > { %p1699_p3 = pnand %p1254_p0, %p325_p2  ;;  %s347_s13 = sshll.u32 %s1597_s30, 4  ;;  %s348_s13 = int_to_ptr.vmem [resolvable:$true] %s347_s13 }
  0x13   : > { %s1598_s17 = smov [#allocation8]   ;;  %s1599_s19 = smov 128  }
  0x14   : > { %p1307_p4 = pneg %p1699_p3  ;;  %s367_s18 = sshll.u32 %s1598_s17, 4  ;;  %s368_s18 = int_to_ptr.vmem [resolvable:$true] %s367_s18 }
  0x15   : > { %s1600_s20 = smov 8   ;;  %s1253_s25 = sadd.s32 4294967294, %s1595_s24  }
  0x16   : > { %s345_s27 = sshll.u32 %s2017_s5, 4  ;;  %p1308_p6 = pnand %p1307_p4, %p53_p1  ;;  %s346_s27 = int_to_ptr.hbm [resolvable:$true] %s345_s27 }
  0x17   : > { %s365_s16 = sshll.u32 %s2019_s8, 4  ;;  %s1713_s26 = sadd.s32 1, %s1595_s24   ;;  %s366_s16 = int_to_ptr.hbm [resolvable:$true] %s365_s16 }
  0x18   : > { %1310 = dma.hbm_to_vmem [thread:$0]  (!%p1308_p6), %s346_s27, 512, %s348_s13, [#allocation6], %s1599_s19, %s1599_s19, %s1600_s20  }
  0x19   : > { %1313 = dma.hbm_to_vmem [thread:$0]  (!%p1308_p6), %s366_s16, 512, %s368_s18, [#allocation9], %s1599_s19, %s1599_s19, %s1600_s20  }
  0x1a   : > { %2020 = sst [smem:[#allocation19_spill]] %s1713_s26  ;;  %s36_s30 = ssub.s32 %s1595_s24, %s1713_s26 }
  0x1b   : > { %s39_s14 = sadd.s32 1, %s1591_s23  ;;  %p37_p7 = scmp.eq.s32.totalorder %s36_s30, 0 }
  0x1c   : > { %p46_p8 = scmp.ne.s32.totalorder %s1591_s23, %s1587_s22  ;;  %p47_p9 = scmp.eq.s32.totalorder %s1595_s24, 0 }
  0x1d   : > { %p52_p10 = scmp.ne.s32.totalorder %s1587_s22, %s1583_s21  ;;  %p312_p13 = scmp.eq.s32.totalorder %s1694_s28, 1 }
  0x1e   : > { %s1724_s15 = scalar_select %p37_p7, %s1591_s23, %s39_s14  }
  0x1f   : > { %p1726_p11 = por %p47_p9, %p46_p8  ;;  %p1732_p12 = por %p53_p1, %p52_p10 }
  0x20   : > { %2021 = sst [smem:[#allocation20_spill]] %s1724_s15  ;;  %p318_p0 = scmp.eq.s32.totalorder %s1253_s25, 1 }
  0x21   : > { %p1327_p2 = scmp.lt.s32.totalorder %s1595_s24, 2  ;;  %s390_s13 = sand.u32 1, %s1591_s23  }
  0x22   : > { %p1739_p4 = por %p312_p13, %p46_p8  ;;  %p1743_p6 = por %p318_p0, %p52_p10 }
  0x23   : > { %s1747_s19 = sshll.u32 %s390_s13, 3  ;;  %s1259_s20 = sshll.u32 %s1595_s24, 3 }
  0x24   : > { %s2024_s16 = scalar_select %p1739_p4, 1, 0 }
  0x25   : > { %s2026_s18 = scalar_select %p1743_p6, 1, 0 }
  0x26   : > { %2025 = sst [smem:[#allocation21_spill]] %s2024_s16  ;;  %s398_s5 = scalar_lea.hbm %s1988_s0, %s1259_s20 }
  0x27   : > { %2027 = sst [smem:[#allocation22_spill]] %s2026_s18  ;;  %s394_s8 = scalar_lea.vmem [#allocation2], %s1747_s19 }
  0x28   : > { %s402_s25 = sshll.u32 %s394_s8, 4  ;;  %s400_s15 = sshll.u32 %s398_s5, 4  ;;  %s403_s25 = int_to_ptr.vmem [resolvable:$true] %s402_s25  ;;  %s401_s15 = int_to_ptr.hbm [resolvable:$true] %s400_s15 }
  0x29   : > { %p1756_p7 = pnand %p1327_p2, %p1726_p11  ;;  %s417_s21 = scalar_lea.hbm %s1989_s1, %s1259_s20 }
  0x2a   : > { %s409_s11 = sand.u32 1, %s1595_s24   ;;  %s391_s16 = scalar_lea.sflag [#allocation3], %s390_s13 }
  0x2b   : > { %s1457_s30 = sshra.s32 %s401_s15, 4  ;;  %p1461_p9 = pneg %p1756_p7  ;;  %s1458_s30 = int_to_ptr.hbm [resolvable:$true] %s1457_s30 }
  0x2c   : > { %s1459_s14 = scalar_lea.hbm %s1458_s30, 8  ;;  %s1464_s17 = scalar_lea.hbm %s1988_s0, 16 }
  0x2d   : > { %p1460_p8 = scmp.ne.s32.totalorder %s1458_s30, %s1459_s14  ;;  %p1465_p13 = scmp.lt.s32.totalorder %s1458_s30, %s1988_s0 }
  0x2e   : > { %p1466_p0 = scmp.lt.s32.totalorder %s1464_s17, %s1459_s14 }
  0x2f   : > { %p1462_p10 = pnand %p1461_p9, %p1460_p8 }
  0x30   : > { %p1467_p2 = por %p1466_p0, %p1465_p13 }
  0x31   : > { %p1463_p11 = pneg %p1462_p10 }
  0x33   : > { %p1468_p5 = pnand %p1467_p2, %p1463_p11 }
  0x35   : > { %1471 = shalt.err (!%p1468_p5)
}
  0x36   : > { %1317 = dma.hbm_to_vmem [thread:$0]  (!%p1756_p7), %s401_s15, 128, %s403_s25, %s391_s16  }
  0x37   : > { %s419_s13 = sshll.u32 %s417_s21, 4  ;;  %s413_s20 = scalar_lea.vmem [#allocation5], %s1747_s19  ;;  %s420_s13 = int_to_ptr.hbm [resolvable:$true] %s419_s13 }
  0x38   : > { %s421_s24 = sshll.u32 %s413_s20, 4  ;;  %s410_s5 = scalar_lea.sflag [#allocation6], %s409_s11  ;;  %s422_s24 = int_to_ptr.vmem [resolvable:$true] %s421_s24 }
  0x39   : > { %s1487_s8 = sshra.s32 %s420_s13, 4  ;;  %s1494_s17 = scalar_lea.hbm %s1989_s1, 16  ;;  %s1488_s8 = int_to_ptr.hbm [resolvable:$true] %s1487_s8 }
  0x3a   : > { %s1489_s12 = scalar_lea.hbm %s1488_s8, 8  ;;  %p1495_p5 = scmp.lt.s32.totalorder %s1488_s8, %s1989_s1 }
  0x3b   : > { %p1490_p8 = scmp.ne.s32.totalorder %s1488_s8, %s1489_s12  ;;  %p1496_p13 = scmp.lt.s32.totalorder %s1494_s17, %s1489_s12 }
  0x3d   : > { %p1492_p10 = pnand %p1490_p8, %p1461_p9  ;;  %p1497_p0 = por %p1496_p13, %p1495_p5 }
  0x3f   : > { %p1493_p11 = pneg %p1492_p10 }
  0x41   : > { %p1498_p2 = pnand %p1497_p0, %p1493_p11 }
  0x43   : > { %1501 = shalt.err (!%p1498_p2)
}
  0x44   : > { %1320 = dma.hbm_to_vmem [thread:$0]  (!%p1756_p7), %s420_s13, 128, %s422_s24, %s410_s5  }
  0x45   : > { %430 = sbr.rel (%p1699_p3) target bundleno = 2223 (0x8af), region = 68  ;;  %s1792_s11 = sand.u32 (!%p1699_p3), 1, %s1587_s22  }
  0x46   : > { %s1795_s21 = sshll.u32 (!%p1699_p3), %s1792_s11, 3  ;;  %s433_s16 = scalar_lea.sflag (!%p1699_p3), [#allocation3], %s1792_s11 }
  0x47   : > { %s436_s12 = scalar_lea.vmem (!%p1699_p3), [#allocation2], %s1795_s21 }
  0x4a   : > { %1562 = dma.done.wait (%p1732_p12), %s433_s16, 128  }
  0x4b   : > { %1564 = vsyncadd (%p1732_p12), %s433_s16, 4294967168  ;;  %s442_s23 = sand.u32 1, %s1694_s28   ;;  %s446_s29 = scalar_lea.vmem [#allocation5], %s1795_s21 }
  0x4c   : > { %s443_s24 = scalar_lea.sflag [#allocation6], %s442_s23 }
  0x4d   : > { %1566 = dma.done.wait (%p1732_p12), %s443_s24, 128  }
  0x4e   : > { %1568 = vsyncadd (%p1732_p12), %s443_s24, 4294967168 }
  0x4f   : > { %1570 = dma.done.wait (%p53_p1), [#allocation6], 512  }
  0x50   : > { %1572 = vsyncadd (%p53_p1), [#allocation6], 4294966784 }
  0x51   : > { %1574 = dma.done.wait (%p53_p1), [#allocation9], 512  }
  0x52   : > { %1576 = vsyncadd (%p53_p1), [#allocation9], 4294966784  ;;  %v536_v0 = vld [vmem:[%s1991_s3 + $0x18] sm:$0xff]  ;;  %v535_v2 = vld [vmem:[%s1991_s3 + $0x10] sm:$0xff]  ;;  %vm509_vm0 = vcmask 261120   ;;  %vm589_vm1 = vcmask 64512  }
  0x53   : > { %v508_v1 = vld [vmem:[%s1990_s2 + $0x18] sm:$0xff]  ;;  %552 = vmatpush.msra.mxu1 %v536_v0  ;;  %v507_v3 = vld [vmem:[%s1990_s2 + $0x10] sm:$0xff]  ;;  %v534_v4 = vld [vmem:[%s1991_s3 + $0x8] sm:$0xff]  ;;  %s1601_s19 = smov 112   ;;  %s1602_s25 = smov 120  }
  0x54   : > { %525 = vmatpush.msra.mxu0 %v508_v1  ;;  %v506_v5 = vld [vmem:[%s1990_s2 + $0x8] sm:$0xff]  ;;  %v533_v6 = vld [vmem:[%s1991_s3] sm:$0xff]  ;;  %v504_v8 = vld [vmem:[%s446_s29] sm:$0xff]  ;;  %s1290_s26 = sshll.u32 %s1694_s28, 3  ;;  %s2031_s13 = sld [smem:[#allocation25_spill]] }
  0x55   : > { %553 = vmatpush.msra.mxu1 %v535_v2  ;;  %v505_v7 = vld [vmem:[%s1990_s2] sm:$0xff]  ;;  %v563_v18 = vld [vmem:[%s1992_s4 + $0x18] sm:$0xff]  ;;  %v562_v19 = vld [vmem:[%s1992_s4 + $0x10] sm:$0xff]  ;;  %s502_s28 = scalar_lea.vmem [#allocation10], %s1795_s21  ;;  %s1126_s5 = scalar_lea.sflag [#allocation4], %s1792_s11 }
  0x56   : > { %526 = vmatpush.msra.mxu0 %v507_v3  ;;  %v503_v9 = vld [vmem:[%s436_s12] sm:$0xff]  ;;  %s1603_s12 = smov 104   ;;  %576 = vmatpush.msra.mxu2 %v563_v18  ;;  %s1138_s27 = sshll.u32 %s502_s28, 4  ;;  %s1139_s27 = int_to_ptr.vmem [resolvable:$true] %s1138_s27 }
  0x57   : > { %554 = vmatpush.msra.mxu1 %v534_v4  ;;  %v561_v20 = vld [vmem:[%s1992_s4 + $0x8] sm:$0xff]  ;;  %v560_v21 = vld [vmem:[%s1992_s4] sm:$0xff] }
  0x58   : > { %527 = vmatpush.msra.mxu0 %v506_v5  ;;  %577 = vmatpush.msra.mxu2 %v562_v19  ;;  %v585_v30 = vld [vmem:[#allocation7] sm:$0xff]  ;;  %v586_v19 = vld [vmem:[#allocation7 + $0x8] sm:$0xff] }
  0x59   : > { %555 = vmatpush.msra.mxu1 %v533_v6 }
  0x5a   : > { %528 = vmatpush.msra.mxu0 %v505_v7  ;;  %1269 = vmatmul.msk.f32.vlgmr.msra.gmra.mxu1 %vm509_vm0, %v504_v8 }
  0x5b   : > { %1268 = vmatmul.msk.f32.vlgmr.msra.gmra.mxu0 %vm509_vm0, %v503_v9  ;;  %578 = vmatpush.msra.mxu2 %v561_v20 }
  0x5d   : > { %579 = vmatpush.msra.mxu2 %v560_v21 }
  0x5e   : > { %1270 = vmatmul.msk.f32.vlgmr.msra.gmra.mxu2 %vm509_vm0, %v504_v8 }
  0x5f   : > { %760 = vmatpush.msrb.mxu2 %v586_v19 }
  0xd7   : > { %v557_v10 = vpop.f32.mrf.mxu1 }
  0xd8   : > { %v1843_v11 = vpop.f32.mrf.mxu0  ;;  %790 = vrot.lane.b32.xlu2 %v557_v10, %s1601_s19  ;;  %665 = vrot.lane.b32.xlu1 %v557_v10, %s1602_s25 }
  0xd9   : > { %v584_v12 = vmul.f32 0.35355338, %v1843_v11  ;;  %1271 = vmatpush.xpose.msk.msrb.mxu0 %vm589_vm1, %v557_v10 }
  0xdc   : > { %1272 = vmatmul.msk.f32.vlgmr.msrb.gmra.mxu0 %vm589_vm1, %v584_v12 }
  0xe0   : > { %892 = vrot.lane.b32.xlu2 %v557_v10, %s1603_s12  ;;  %663 = vrot.lane.b32.xlu1 %v584_v12, %s1602_s25 }
  0xe1   : > { %v1873_v31 = vpop.f32.mrf.mxu2 }
  0xe2   : > { %658 = vmatpush.msra.mxu3 %v1873_v31 }
  0xe4   : > { %783 = vmatpush.msrb.mxu3 %v585_v30 }
  0xe8   : > { %890 = vrot.lane.b32.xlu1 %v584_v12, %s1603_s12 }
 0x132   : > { %v791_v14 = vpop.permute.xlu2 %790 }
 0x13a   : > { %v893_v29 = vpop.permute.xlu2 %892 }
 0x14a   : > { %v666_v13 = vpop.permute.xlu1 %665 }
 0x14b   : > { %1274 = vmatpush.xpose.msk.msra.mxu0 %vm589_vm1, %v666_v13 }
 0x14f   : > { %1279 = vmatpush.xpose.msk.msrb.mxu0 %vm589_vm1, %v791_v14 }
 0x152   : > { %v664_v15 = vpop.permute.xlu1 %663 }
 0x153   : > { %1275 = vmatmul.msk.f32.vlgmr.msra.gmra.mxu0 %vm589_vm1, %v664_v15 }
 0x159   : > { %v613_v16 = vpop.f32.mrf.mxu0 }
 0x15a   : > { %v616_v17 = vsel %vm589_vm1, %v613_v16, -inf  ;;  %v891_v53 = vpop.permute.xlu1 %890 }
 0x15b   : > { %617 = vmax.xlane.f32.xlu0 %v616_v17 }
 0x1ce   : > { %v618_v22 = vpop.xlane.xlu0 %617 }
 0x1cf   : > { %v619_v23 = vsub.f32 %v613_v16, %v618_v22 }
 0x1d0   : > { %v688_v24 = vpop.f32.mrf.mxu0 }
 0x1d1   : > { %v620_v25 = vmul.f32 1.442695, %v619_v23  ;;  %v691_v26 = vsel %vm589_vm1, %v688_v24, -inf }
 0x1d2   : > { %692 = vmax.xlane.f32.xlu2 %v691_v26 }
 0x1d3   : > { %1375 = vpow2.f32 %v620_v25 }
 0x1d9   : > { %v1376_v27 = vpop.eup %1375 }
 0x1da   : > { %v622_v28 = vsel %vm589_vm1, %v1376_v27, 0.0 }
 0x1db   : > { %623 = vadd.xlane.f32.xlu0 %v622_v28 }
 0x1ef   : > { %788 = vrot.lane.b32.xlu0 %v584_v12, %s1601_s19 }
 0x245   : > { %v693_v32 = vpop.xlane.xlu2 %692 }
 0x246   : > { %v694_v33 = vsub.f32 %v688_v24, %v693_v32 }
 0x248   : > { %v695_v34 = vmul.f32 1.442695, %v694_v33 }
 0x24a   : > { %1377 = vpow2.f32 %v695_v34 }
 0x24e   : > { %v624_v35 = vpop.xlane.xlu0 %623 }
 0x24f   : > { %1379 = vrcp.f32 %v624_v35  ;;  %v636_v41 = vand.u32 2147483648, %v624_v35  ;;  %v634_v43 = vand.u32 2147483647, %v624_v35  ;;  %vm630_vm3 = vweird.f32 %v624_v35 }
 0x250   : > { %v1378_v36 = vpop.eup %1377 }
 0x251   : > { %v697_v37 = vsel %vm589_vm1, %v1378_v36, 0.0  ;;  %v637_v45 = vor.u32 1.1754944e-38, %v636_v41  ;;  %vm635_vm5 = vcmp.eq.f32.partialorder %v634_v43, 8.507059e+37 }
 0x252   : > { %698 = vadd.xlane.f32.xlu2 %v697_v37 }
 0x255   : > { %v1380_v38 = vpop.eup %1379 }
 0x256   : > { %v626_v39 = vmul.f32 %v1380_v38, %v624_v35  ;;  %vm631_vm2 = vweird.f32 %v1380_v38 }
 0x257   : > { %vm632_vm4 = vmor %vm630_vm3, %vm631_vm2 }
 0x258   : > { %v627_v40 = vsub.f32 1.0, %v626_v39 }
 0x25a   : > { %v628_v42 = vmul.f32 %v1380_v38, %v627_v40 }
 0x25c   : > { %v629_v44 = vadd.f32 %v1380_v38, %v628_v42 }
 0x25e   : > { %v633_v46 = vsel %vm632_vm4, %v1380_v38, %v629_v44 }
 0x25f   : > { %v638_v47 = vsel %vm635_vm5, %v637_v45, %v633_v46  ;;  %v588_v45 = vld [vmem:[#allocation7 + $0x18] sm:$0xff]  ;;  %v587_v46 = vld [vmem:[#allocation7 + $0x10] sm:$0xff] }
 0x260   : > { %v639_v48 = vmul.f32 %v1376_v27, %v638_v47  ;;  %884 = vmatpush.msra.mxu2 %v587_v46 }
 0x261   : > { %v789_v49 = vpop.permute.xlu0 %788 }
 0x262   : > { %1273 = vmatmul.msk.f32.vlgmr.msra.gmra.mxu3 %vm589_vm1, %v639_v48  ;;  %1280 = vmatmul.msk.f32.vlgmr.msrb.gmra.mxu0 %vm589_vm1, %v789_v49 }
 0x263   : > { %1283 = vmatpush.xpose.msk.msra.mxu3 %vm589_vm1, %v893_v29 }
 0x2c5   : > { %v699_v62 = vpop.xlane.xlu2 %698 }
 0x2c6   : > { %v711_v4 = vand.u32 2147483648, %v699_v62  ;;  %vm705_vm7 = vweird.f32 %v699_v62  ;;  %v709_v5 = vand.u32 2147483647, %v699_v62 }
 0x2c8   : > { %v712_v8 = vor.u32 1.1754944e-38, %v711_v4  ;;  %vm710_vm9 = vcmp.eq.f32.partialorder %v709_v5, 8.507059e+37  ;;  %v1035_v4 = vld [vmem:[#allocation8 + $0x18] sm:$0xff]  ;;  %v1034_v5 = vld [vmem:[#allocation8 + $0x10] sm:$0xff] }
 0x2df   : > { %v813_v50 = vpop.f32.mrf.mxu0 }
 0x2e0   : > { %v816_v51 = vsel %vm589_vm1, %v813_v50, -inf }
 0x2e1   : > { %817 = vmax.xlane.f32.xlu1 %v816_v51 }
 0x2e5   : > { %v660_v52 = vpop.f32.mrf.mxu3 }
 0x2e6   : > { %1278 = vmatmul.msk.f32.vlgmr.msrb.gmra.mxu3 %vm589_vm1, %v660_v52 }
 0x2ee   : > { %1284 = vmatmul.msk.f32.vlgmr.msra.gmra.mxu3 %vm589_vm1, %v891_v53 }
 0x354   : > { %v818_v54 = vpop.xlane.xlu1 %817 }
 0x355   : > { %v819_v55 = vsub.f32 %v813_v50, %v818_v54 }
 0x357   : > { %v820_v56 = vmul.f32 1.442695, %v819_v55 }
 0x359   : > { %1381 = vpow2.f32 %v820_v56 }
 0x35a   : > { %1383 = vrcp.f32 %v699_v62 }
 0x35f   : > { %v1883_v57 = vpop.eup %1381 }
 0x360   : > { %v822_v58 = vsel %vm589_vm1, %v1883_v57, 0.0  ;;  %v1384_v63 = vpop.eup %1383 }
 0x361   : > { %823 = vadd.xlane.f32.xlu2 %v822_v58  ;;  %v701_v0 = vmul.f32 %v1384_v63, %v699_v62  ;;  %vm706_vm6 = vweird.f32 %v1384_v63 }
 0x362   : > { %vm707_vm8 = vmor %vm705_vm7, %vm706_vm6  ;;  %vm1068_vm7 = vcmask 523264  }
 0x363   : > { %v702_v1 = vsub.f32 1.0, %v701_v0 }
 0x365   : > { %v703_v2 = vmul.f32 %v1384_v63, %v702_v1 }
 0x367   : > { %v704_v3 = vadd.f32 %v1384_v63, %v703_v2 }
 0x369   : > { %v1887_v59 = vpop.f32.mrf.mxu3  ;;  %v708_v7 = vsel %vm707_vm8, %v1384_v63, %v704_v3 }
 0x36a   : > { %v713_v9 = vsel %vm710_vm9, %v712_v8, %v708_v7  ;;  %v1032_v7 = vld [vmem:[#allocation8] sm:$0xff]  ;;  %v1067_v8 = vld [vmem:[%s1997_s9 + $0x38] sm:$0xff] }
 0x36b   : > { %v714_v12 = vmul.f32 %v1378_v36, %v713_v9  ;;  %v1066_v9 = vld [vmem:[%s1997_s9 + $0x30] sm:$0xff]  ;;  %1080 = vmatpush.msrb.mxu3 %v1067_v8 }
 0x36d   : > { %1081 = vmatpush.msrb.mxu3 %v1066_v9 }
 0x371   : > { %v915_v60 = vpop.f32.mrf.mxu3 }
 0x372   : > { %v918_v61 = vsel %vm589_vm1, %v915_v60, -inf }
 0x373   : > { %919 = vmax.xlane.f32.xlu0 %v918_v61 }
 0x379   : > { %716 = vrot.lane.b32.xlu2 %v1873_v31, %s1602_s25 }
 0x387   : > { %942 = vrot.lane.b32.xlu0 %v1873_v31, %s1603_s12 }
 0x3d4   : > { %v824_v6 = vpop.xlane.xlu2 %823 }
 0x3d5   : > { %v836_v34 = vand.u32 2147483648, %v824_v6  ;;  %vm830_vm14 = vweird.f32 %v824_v6  ;;  %v834_v36 = vand.u32 2147483647, %v824_v6 }
 0x3d7   : > { %v837_v41 = vor.u32 1.1754944e-38, %v836_v34  ;;  %vm835_vm3 = vcmp.eq.f32.partialorder %v834_v36, 8.507059e+37 }
 0x3dc   : > { %v717_v10 = vpop.permute.xlu2 %716 }
 0x3dd   : > { %737 = vmatpush.msrb.mxu1 %v717_v10  ;;  %v1065_v10 = vld [vmem:[%s1997_s9 + $0x28] sm:$0xff] }
 0x3de   : > { %1276 = vmatmul.msk.f32.vlgmr.msrb.gmra.mxu1 %vm589_vm1, %v714_v12  ;;  %1082 = vmatpush.msrb.mxu3 %v1065_v10 }
 0x3e6   : > { %v920_v13 = vpop.xlane.xlu0 %919 }
 0x3e7   : > { %v921_v14 = vsub.f32 %v915_v60, %v920_v13 }
 0x3e9   : > { %v922_v15 = vmul.f32 1.442695, %v921_v14  ;;  %v1064_v14 = vld [vmem:[%s1997_s9 + $0x20] sm:$0xff] }
 0x3ea   : > { %1083 = vmatpush.msrb.mxu3 %v1064_v14 }
 0x3eb   : > { %1385 = vpow2.f32 %v922_v15 }
 0x3ec   : > { %1387 = vrcp.f32 %v824_v6 }
 0x3f1   : > { %v1386_v16 = vpop.eup %1385 }
 0x3f2   : > { %v924_v17 = vsel %vm589_vm1, %v1386_v16, 0.0  ;;  %v1388_v21 = vpop.eup %1387 }
 0x3f3   : > { %925 = vadd.xlane.f32.xlu1 %v924_v17  ;;  %v826_v23 = vmul.f32 %v1388_v21, %v824_v6  ;;  %vm831_vm11 = vweird.f32 %v1388_v21  ;;  %v1033_v6 = vld [vmem:[#allocation8 + $0x8] sm:$0xff]  ;;  %v1062_v17 = vld [vmem:[%s1997_s9 + $0x10] sm:$0xff] }
 0x3f4   : > { %vm832_vm2 = vmor %vm830_vm14, %vm831_vm11 }
 0x3f5   : > { %v827_v24 = vsub.f32 1.0, %v826_v23 }
 0x3f7   : > { %v828_v27 = vmul.f32 %v1388_v21, %v827_v24  ;;  %v1371_v24 = vld [vmem:[%s1994_s6] ss:$0 sm:$0xff] }
 0x3f9   : > { %v943_v18 = vpop.permute.xlu0 %942 }
 0x3fa   : > { %963 = vmatpush.msra.mxu0 %v943_v18 }
 0x40c   : > { %840 = vrot.lane.b32.xlu1 %v1873_v31, %s1601_s19  ;;  %v829_v31 = vadd.f32 %v1388_v21, %v828_v27  ;;  %v1372_v27 = vld [vmem:[%s1995_s7] ss:$0 sm:$0xff]  ;;  %s2029_s19 = sld [smem:[#allocation26_spill]] }
 0x40e   : > { %v833_v39 = vsel %vm832_vm2, %v1388_v21, %v829_v31 }
 0x40f   : > { %v838_v42 = vsel %vm835_vm3, %v837_v41, %v833_v39 }
 0x410   : > { %v839_v44 = vmul.f32 %v1883_v57, %v838_v42  ;;  %v1604_v57 = vmov 32.0  }
 0x412   : > { %s1136_s25 = scalar_lea.hbm %s2029_s19, %s1290_s26  ;;  %s1537_s21 = scalar_lea.hbm %s2029_s19, 16 }
 0x413   : > { %s1140_s20 = sshll.u32 %s1136_s25, 4  ;;  %s1141_s20 = int_to_ptr.hbm [resolvable:$true] %s1140_s20 }
 0x414   : > { %s1531_s8 = sshra.s32 %s1141_s20, 4  ;;  %s1532_s8 = int_to_ptr.hbm [resolvable:$true] %s1531_s8 }
 0x415   : > { %s1533_s30 = scalar_lea.hbm %s1532_s8, 8  ;;  %p1538_p7 = scmp.lt.s32.totalorder %s1532_s8, %s2029_s19 }
 0x416   : > { %p1534_p1 = scmp.ne.s32.totalorder %s1532_s8, %s1533_s30  ;;  %p1539_p9 = scmp.lt.s32.totalorder %s1537_s21, %s1533_s30 }
 0x418   : > { %p1535_p3 = pnand %p1534_p1, %p1739_p4  ;;  %p1540_p8 = por %p1539_p9, %p1538_p7 }
 0x41a   : > { %p1536_p12 = pneg %p1535_p3 }
 0x41c   : > { %p1541_p10 = pnand %p1540_p8, %p1536_p12 }
 0x45b   : > { %v739_v20 = vpop.f32.mrf.mxu1 }
 0x45c   : > { %1277 = vmatmul.msk.f32.vlgmr.msrb.gmra.mxu2 %vm589_vm1, %v739_v20 }
 0x45d   : > { %1051 = vmatpush.msrb.mxu2 %v1035_v4 }
 0x45f   : > { %1052 = vmatpush.msrb.mxu2 %v1034_v5 }
 0x461   : > { %1053 = vmatpush.msrb.mxu2 %v1033_v6 }
 0x463   : > { %1054 = vmatpush.msrb.mxu2 %v1032_v7 }
 0x466   : > { %v926_v22 = vpop.xlane.xlu1 %925 }
 0x467   : > { %1389 = vrcp.f32 %v926_v22  ;;  %v938_v29 = vand.u32 2147483648, %v926_v22  ;;  %v936_v32 = vand.u32 2147483647, %v926_v22  ;;  %vm932_vm12 = vweird.f32 %v926_v22 }
 0x468   : > { %1391 = vrcp.f32 %v1604_v57 }
 0x469   : > { %v939_v35 = vor.u32 1.1754944e-38, %v938_v29  ;;  %vm937_vm15 = vcmp.eq.f32.partialorder %v936_v32, 8.507059e+37  ;;  %v1060_v32 = vld [vmem:[%s1997_s9] sm:$0xff] }
 0x46d   : > { %v1390_v25 = vpop.eup %1389 }
 0x46e   : > { %v928_v26 = vmul.f32 %v1390_v25, %v926_v22  ;;  %vm933_vm10 = vweird.f32 %v1390_v25  ;;  %v1392_v58 = vpop.eup %1391 }
 0x46f   : > { %vm934_vm13 = vmor %vm932_vm12, %vm933_vm10  ;;  %v999_v60 = vmul.f32 32.0, %v1392_v58 }
 0x470   : > { %v929_v28 = vsub.f32 1.0, %v928_v26 }
 0x471   : > { %v1000_v61 = vsub.f32 1.0, %v999_v60 }
 0x472   : > { %v930_v30 = vmul.f32 %v1390_v25, %v929_v28 }
 0x473   : > { %v1001_v62 = vmul.f32 %v1392_v58, %v1000_v61 }
 0x474   : > { %v931_v33 = vadd.f32 %v1390_v25, %v930_v30  ;;  %v1061_v30 = vld [vmem:[%s1997_s9 + $0x8] sm:$0xff] }
 0x475   : > { %v1002_v63 = vadd.f32 %v1392_v58, %v1001_v62 }
 0x476   : > { %v935_v37 = vsel %vm934_vm13, %v1390_v25, %v931_v33 }
 0x477   : > { %v940_v38 = vsel %vm937_vm15, %v939_v35, %v935_v37 }
 0x478   : > { %v941_v40 = vmul.f32 %v1386_v16, %v940_v38  ;;  %v1063_v16 = vld [vmem:[%s1997_s9 + $0x18] sm:$0xff] }
 0x479   : > { %1084 = vmatpush.msrb.mxu3 %v1063_v16 }
 0x47a   : > { %1285 = vmatmul.msk.f32.vlgmr.msra.gmra.mxu0 %vm589_vm1, %v941_v40 }
 0x47b   : > { %1085 = vmatpush.msrb.mxu3 %v1062_v17 }
 0x47d   : > { %1086 = vmatpush.msrb.mxu3 %v1061_v30 }
 0x47e   : > { %v841_v43 = vpop.permute.xlu1 %840 }
 0x47f   : > { %861 = vmatpush.msra.mxu1 %v841_v43  ;;  %1087 = vmatpush.msrb.mxu3 %v1060_v32 }
 0x480   : > { %1281 = vmatmul.msk.f32.vlgmr.msra.gmra.mxu1 %vm589_vm1, %v839_v44 }
 0x481   : > { %986 = vmatpush.msrb.mxu1 %v588_v45 }
 0x4df   : > { %v762_v49 = vpop.f32.mrf.mxu2 }
 0x4e0   : > { %v786_v50 = vadd.f32 %v1887_v59, %v762_v49 }
 0x4f7   : > { %v965_v47 = vpop.f32.mrf.mxu0 }
 0x4f8   : > { %1286 = vmatmul.msk.f32.vlgmr.msrb.gmra.mxu1 %vm589_vm1, %v965_v47 }
 0x4fd   : > { %v863_v48 = vpop.f32.mrf.mxu1 }
 0x4fe   : > { %1282 = vmatmul.msk.f32.vlgmr.msra.gmra.mxu2 %vm589_vm1, %v863_v48  ;;  %vm1003_vm1 = vweird.f32 %v1392_v58 }
 0x4ff   : > { %v1907_v0 = vsel %vm1003_vm1, %v1392_v58, %v1002_v63 }
 0x575   : > { %v988_v53 = vpop.f32.mrf.mxu1 }
 0x581   : > { %v886_v51 = vpop.f32.mrf.mxu2 }
 0x582   : > { %v889_v52 = vadd.f32 %v886_v51, %v786_v50  ;;  %v1373_v51 = vld [vmem:[%s1998_s10] ss:$0 sm:$0xff] }
 0x584   : > { %v991_v54 = vadd.f32 %v988_v53, %v889_v52 }
 0x586   : > { %v992_v55 = vadd.f32 %v991_v54, %v1843_v11  ;;  %v1374_v54 = vld [vmem:[%s2031_s13] ss:$0 sm:$0xff] }
 0x588   : > { %v995_v56 = vsel %vm509_vm0, %v992_v55, 0.0 }
 0x589   : > { %996 = vadd.xlane.f32.xlu2 %v995_v56 }
 0x5fc   : > { %v997_v59 = vpop.xlane.xlu2 %996 }
 0x5fd   : > { %v1005_v1 = vmul.f32 %v1907_v0, %v997_v59 }
 0x5ff   : > { %v1006_v2 = vsub.f32 %v992_v55, %v1005_v1 }
 0x601   : > { %v1007_v3 = vmul.f32 %v1006_v2, %v1006_v2 }
 0x603   : > { %v1008_v11 = vsel %vm509_vm0, %v1007_v3, 0.0 }
 0x604   : > { %1009 = vadd.xlane.f32.xlu0 %v1008_v11 }
 0x677   : > { %v1010_v12 = vpop.xlane.xlu0 %1009 }
 0x678   : > { %v1011_v13 = vmul.f32 %v1010_v12, %v1907_v0 }
 0x67a   : > { %v1012_v15 = vadd.f32 1e-05, %v1011_v13 }
 0x67c   : > { %1393 = vrsqrt.f32 %v1012_v15  ;;  %vm1019_vm5 = vweird.f32 %v1012_v15 }
 0x682   : > { %v1394_v18 = vpop.eup %1393 }
 0x683   : > { %v1014_v19 = vmul.f32 %v1394_v18, %v1012_v15  ;;  %vm1020_vm4 = vweird.f32 %v1394_v18 }
 0x684   : > { %vm1021_vm6 = vmor %vm1019_vm5, %vm1020_vm4 }
 0x685   : > { %v1015_v20 = vmul.f32 %v1394_v18, %v1014_v19 }
 0x687   : > { %v1016_v21 = vmul.f32 0.5, %v1015_v20 }
 0x689   : > { %v1017_v22 = vsub.f32 1.5, %v1016_v21 }
 0x68b   : > { %v1018_v23 = vmul.f32 %v1394_v18, %v1017_v22 }
 0x68d   : > { %v1022_v25 = vsel %vm1021_vm6, %v1394_v18, %v1018_v23 }
 0x68e   : > { %v1023_v26 = vmul.f32 %v1022_v25, %v1006_v2 }
 0x690   : > { %v1027_v28 = vmul.f32 %v1371_v24, %v1023_v26 }
 0x692   : > { %v1031_v29 = vadd.f32 %v1372_v27, %v1027_v28 }
 0x694   : > { %1287 = vmatmul.msk.f32.vlgmr.msrb.gmra.mxu2 %vm509_vm0, %v1031_v29 }
 0x717   : > { %v1056_v31 = vpop.f32.mrf.mxu2 }
 0x718   : > { %v1059_v33 = vmax.f32 %v1056_v31, 0.0 }
 0x71a   : > { %1288 = vmatmul.msk.f32.vlgmr.msrb.gmra.mxu3 %vm1068_vm7, %v1059_v33 }
 0x79d   : > { %v1089_v34 = vpop.f32.mrf.mxu3 }
 0x79e   : > { %v1090_v35 = vadd.f32 %v1089_v34, %v1031_v29 }
 0x7a0   : > { %v1094_v36 = vsel %vm509_vm0, %v1090_v35, 0.0 }
 0x7a1   : > { %1095 = vadd.xlane.f32.xlu1 %v1094_v36 }
 0x814   : > { %v1096_v37 = vpop.xlane.xlu1 %1095 }
 0x815   : > { %v1097_v38 = vmul.f32 %v1096_v37, %v1907_v0 }
 0x817   : > { %v1098_v39 = vsub.f32 %v1090_v35, %v1097_v38 }
 0x819   : > { %v1099_v40 = vmul.f32 %v1098_v39, %v1098_v39 }
 0x81b   : > { %v1100_v41 = vsel %vm509_vm0, %v1099_v40, 0.0 }
 0x81c   : > { %1101 = vadd.xlane.f32.xlu2 %v1100_v41 }
 0x88f   : > { %v1102_v42 = vpop.xlane.xlu2 %1101 }
 0x890   : > { %v1103_v43 = vmul.f32 %v1102_v42, %v1907_v0 }
 0x892   : > { %v1104_v44 = vadd.f32 1e-05, %v1103_v43 }
 0x894   : > { %1395 = vrsqrt.f32 %v1104_v44  ;;  %vm1111_vm9 = vweird.f32 %v1104_v44 }
 0x89a   : > { %v1396_v45 = vpop.eup %1395 }
 0x89b   : > { %v1106_v46 = vmul.f32 %v1396_v45, %v1104_v44  ;;  %vm1112_vm8 = vweird.f32 %v1396_v45 }
 0x89c   : > { %vm1113_vm10 = vmor %vm1111_vm9, %vm1112_vm8 }
 0x89d   : > { %v1107_v47 = vmul.f32 %v1396_v45, %v1106_v46 }
 0x89f   : > { %v1108_v48 = vmul.f32 0.5, %v1107_v47 }
 0x8a1   : > { %v1109_v49 = vsub.f32 1.5, %v1108_v48 }
 0x8a3   : > { %v1110_v50 = vmul.f32 %v1396_v45, %v1109_v49 }
 0x8a5   : > { %v1114_v52 = vsel %vm1113_vm10, %v1396_v45, %v1110_v50 }
 0x8a6   : > { %v1115_v53 = vmul.f32 %v1114_v52, %v1098_v39 }
 0x8a8   : > { %v1119_v55 = vmul.f32 %v1373_v51, %v1115_v53 }
 0x8aa   : > { %v1123_v56 = vadd.f32 %v1374_v54, %v1119_v55 }
 0x8ac   : > { %1124 = vst.msk [vmem:[%s502_s28] sm:$0xff] %vm509_vm0, %v1123_v56 }
 0x8ad   : > { %1544 = shalt.err (!%p1541_p10)
}
 0x8ae   : > { %1305 = dma.vmem_to_hbm [thread:$0]  (%p1739_p4), %s1139_s27, 128, %s1141_s20, %s1126_s5  }
 0x8af PF: > { %s2032_s11 = sld [smem:[#allocation16_spill]] }
 0x8b0   : > { %s2034_s23 = sld [smem:[#allocation18_spill]] }
 0x8b5   : > { %s1152_s24 = sand.u32 1, %s2032_s11  }
 0x8b6   : > { %p2035_p11 = scmp.ge.s32.totalorder %s2034_s23, 2  ;;  %s1153_s25 = scalar_lea.sflag [#allocation4], %s1152_s24 }
 0x8b8   : > { %p1322_p5 = pnand %p2035_p11, %p1743_p6 }
 0x8ba   : > { %p1323_p13 = pneg %p1322_p5 }
 0x8bc   : > { %1578 = dma.done.wait (%p1323_p13), %s1153_s25, 128  }
 0x8bd   : > { %1580 = vsyncadd (%p1323_p13), %s1153_s25, 4294967168  ;;  %s2036_s24 = sld [smem:[#allocation19_spill]]  ;;  %s2039_s21 = smov %s1587_s22 }
 0x8be   : > { %s2037_s29 = sld [smem:[#allocation17_spill]] }
 0x8bf   : > { %s2038_s23 = sld [smem:[#allocation20_spill]] }
 0x8c3   : > { %p29_p0 = scmp.ge.s32.totalorder %s2036_s24, 4  }
 0x8c4   : > { %s2040_s22 = smov %s2037_s29 }
 0x8c5   :  { %31 = sbr.rel (!%p29_p0) target bundleno = 13 (0xd), region = 134 }
 0x8ca   :  { %1159 = vsyncpa [#allocation3], 1 }
 0x8cb   :  { %1161 = vsyncpa [#allocation3 + $0x1], 1 }
 0x8cc   :  { %1162 = vsyncpa [#allocation6], 1 }
 0x8cd   :  { %1164 = vsyncpa [#allocation6 + $0x1], 1 }
 0x8ce   :  { %1165 = vsyncpa [#allocation9], 1 }
 0x8cf   :  { %1166 = vsyncpa [#allocation4], 1 }
 0x8d0   :  { %1168 = vsyncpa [#allocation4 + $0x1], 1 }

// kernel: tpu_custom_call.1
= control target key start
LH: loop header
LB: loop body
LE: loop exit
PB: predicated region body
PF: predicated region fallthrough
CT: control target
= control target key end

     0   :  { %s1988_s0 = inlined_call_operand.hbm [shape: f32[2,8,32], index: 0, kind: input, shape index: {}]   ;;  %s1989_s1 = inlined_call_operand.hbm [shape: f32[2,8,32], index: 1, kind: input, shape index: {}]   ;;  %s1990_s2 = inlined_call_operand.vmem [shape: f32[32,32], index: 2, kind: input, shape index: {}]   ;;  %s1991_s3 = inlined_call_operand.vmem [shape: f32[32,32], index: 3, kind: input, shape index: {}]   ;;  %s1992_s4 = inlined_call_operand.vmem [shape: f32[32,32], index: 4, kind: input, shape index: {}]   ;;  %s1993_s5 = inlined_call_operand.hbm [shape: f32[32,32], index: 5, kind: input, shape index: {}]   ;;  %s1994_s6 = inlined_call_operand.vmem [shape: f32[1,32], index: 6, kind: input, shape index: {}]   ;;  %s1995_s7 = inlined_call_operand.vmem [shape: f32[1,32], index: 7, kind: input, shape index: {}]   ;;  %s1996_s8 = inlined_call_operand.hbm [shape: f32[32,64], index: 8, kind: input, shape index: {}]   ;;  %s1997_s9 = inlined_call_operand.vmem [shape: f32[64,32], index: 9, kind: input, shape index: {}]   ;;  %s1998_s10 = inlined_call_operand.vmem [shape: f32[1,32], index: 10, kind: input, shape index: {}]   ;;  %s1999_s11 = inlined_call_operand.vmem [shape: f32[1,32], index: 11, kind: input, shape index: {}]   ;;  %s2000_s12 = inlined_call_operand.hbm [shape: f32[2,8,32], index: 12, kind: output, shape index: {}]  }
   0x1   :  { %2010 = sst [smem:[#allocation23_spill]] %s1993_s5 }
   0x2   :  { %2011 = sst [smem:[#allocation24_spill]] %s1996_s8 }
   0x3   :  { %2012 = sst [smem:[#allocation25_spill]] %s1999_s11 }
   0x4   :  { %2013 = sst [smem:[#allocation26_spill]] %s2000_s12 }
   0x5   :  { %17 = vsyncpa [#allocation3], 0 }
   0x6   :  { %19 = vsyncpa [#allocation3 + $0x1], 0 }
   0x7   :  { %20 = vsyncpa [#allocation6], 0 }
   0x8   :  { %22 = vsyncpa [#allocation6 + $0x1], 0 }
   0x9   :  { %23 = vsyncpa [#allocation9], 0 }
   0xa   :  { %24 = vsyncpa [#allocation4], 0 }
   0xb   :  { %26 = vsyncpa [#allocation4 + $0x1], 0  ;;  %s1670_s21 = smov 0   ;;  %s1672_s22 = smov 0  }
   0xc   :  { %s1674_s23 = smov 0   ;;  %s1676_s24 = smov 0  }
   0xd LB: > { %2014 = sst [smem:[#allocation16_spill]] %s1583_s21  ;;  %s1694_s28 = sadd.s32 4294967295, %s1595_s24   ;;  %s1595_s24 = sphi %s1676_s24, %s2036_s24   ;;  %s1591_s23 = sphi %s1674_s23, %s2038_s23   ;;  %s1587_s22 = sphi %s1672_s22, %s2040_s22   ;;  %s1583_s21 = sphi %s1670_s21, %s2039_s21  }
   0xe   : > { %2015 = sst [smem:[#allocation17_spill]] %s1591_s23  ;;  %p1254_p0 = scmp.ge.s32.totalorder %s1595_s24, 1 }
   0xf   : > { %2016 = sst [smem:[#allocation18_spill]] %s1595_s24  ;;  %p53_p1 = scmp.eq.s32.totalorder %s1694_s28, 0 }
  0x10   : > { %s2017_s5 = sld [smem:[#allocation23_spill]]  ;;  %p325_p2 = scmp.lt.s32.totalorder %s1595_s24, 3 }
  0x11   : > { %s1597_s30 = smov [#allocation7]   ;;  %s2019_s8 = sld [smem:[#allocation24_spill]] }
  0x12   : > { %p1699_p3 = pnand %p1254_p0, %p325_p2  ;;  %s347_s13 = sshll.u32 %s1597_s30, 4  ;;  %s348_s13 = int_to_ptr.vmem [resolvable:$true] %s347_s13 }
  0x13   : > { %s1598_s17 = smov [#allocation8]   ;;  %s1599_s19 = smov 128  }
  0x14   : > { %p1307_p4 = pneg %p1699_p3  ;;  %s367_s18 = sshll.u32 %s1598_s17, 4  ;;  %s368_s18 = int_to_ptr.vmem [resolvable:$true] %s367_s18 }
  0x15   : > { %s1600_s20 = smov 8   ;;  %s1253_s25 = sadd.s32 4294967294, %s1595_s24  }
  0x16   : > { %s345_s27 = sshll.u32 %s2017_s5, 4  ;;  %p1308_p6 = pnand %p1307_p4, %p53_p1  ;;  %s346_s27 = int_to_ptr.hbm [resolvable:$true] %s345_s27 }
  0x17   : > { %s365_s16 = sshll.u32 %s2019_s8, 4  ;;  %s1713_s26 = sadd.s32 1, %s1595_s24   ;;  %s366_s16 = int_to_ptr.hbm [resolvable:$true] %s365_s16 }
  0x18   : > { %1310 = dma.hbm_to_vmem [thread:$0]  (!%p1308_p6), %s346_s27, 512, %s348_s13, [#allocation6], %s1599_s19, %s1599_s19, %s1600_s20  }
  0x19   : > { %1313 = dma.hbm_to_vmem [thread:$0]  (!%p1308_p6), %s366_s16, 512, %s368_s18, [#allocation9], %s1599_s19, %s1599_s19, %s1600_s20  }
  0x1a   : > { %2020 = sst [smem:[#allocation19_spill]] %s1713_s26  ;;  %s36_s30 = ssub.s32 %s1595_s24, %s1713_s26 }
  0x1b   : > { %s39_s14 = sadd.s32 1, %s1591_s23  ;;  %p37_p7 = scmp.eq.s32.totalorder %s36_s30, 0 }
  0x1c   : > { %p46_p8 = scmp.ne.s32.totalorder %s1591_s23, %s1587_s22  ;;  %p47_p9 = scmp.eq.s32.totalorder %s1595_s24, 0 }
  0x1d   : > { %p52_p10 = scmp.ne.s32.totalorder %s1587_s22, %s1583_s21  ;;  %p312_p13 = scmp.eq.s32.totalorder %s1694_s28, 1 }
  0x1e   : > { %s1724_s15 = scalar_select %p37_p7, %s1591_s23, %s39_s14  }
  0x1f   : > { %p1726_p11 = por %p47_p9, %p46_p8  ;;  %p1732_p12 = por %p53_p1, %p52_p10 }
  0x20   : > { %2021 = sst [smem:[#allocation20_spill]] %s1724_s15  ;;  %p318_p0 = scmp.eq.s32.totalorder %s1253_s25, 1 }
  0x21   : > { %p1327_p2 = scmp.lt.s32.totalorder %s1595_s24, 2  ;;  %s390_s13 = sand.u32 1, %s1591_s23  }
  0x22   : > { %p1739_p4 = por %p312_p13, %p46_p8  ;;  %p1743_p6 = por %p318_p0, %p52_p10 }
  0x23   : > { %s1747_s19 = sshll.u32 %s390_s13, 3  ;;  %s1259_s20 = sshll.u32 %s1595_s24, 3 }
  0x24   : > { %s2024_s16 = scalar_select %p1739_p4, 1, 0 }
  0x25   : > { %s2026_s18 = scalar_select %p1743_p6, 1, 0 }
  0x26   : > { %2025 = sst [smem:[#allocation21_spill]] %s2024_s16  ;;  %s398_s5 = scalar_lea.hbm %s1988_s0, %s1259_s20 }
  0x27   : > { %2027 = sst [smem:[#allocation22_spill]] %s2026_s18  ;;  %s394_s8 = scalar_lea.vmem [#allocation2], %s1747_s19 }
  0x28   : > { %s402_s25 = sshll.u32 %s394_s8, 4  ;;  %s400_s15 = sshll.u32 %s398_s5, 4  ;;  %s403_s25 = int_to_ptr.vmem [resolvable:$true] %s402_s25  ;;  %s401_s15 = int_to_ptr.hbm [resolvable:$true] %s400_s15 }
  0x29   : > { %p1756_p7 = pnand %p1327_p2, %p1726_p11  ;;  %s417_s21 = scalar_lea.hbm %s1989_s1, %s1259_s20 }
  0x2a   : > { %s409_s11 = sand.u32 1, %s1595_s24   ;;  %s391_s16 = scalar_lea.sflag [#allocation3], %s390_s13 }
  0x2b   : > { %s1457_s30 = sshra.s32 %s401_s15, 4  ;;  %p1461_p9 = pneg %p1756_p7  ;;  %s1458_s30 = int_to_ptr.hbm [resolvable:$true] %s1457_s30 }
  0x2c   : > { %s1459_s14 = scalar_lea.hbm %s1458_s30, 8  ;;  %s1464_s17 = scalar_lea.hbm %s1988_s0, 16 }
  0x2d   : > { %p1460_p8 = scmp.ne.s32.totalorder %s1458_s30, %s1459_s14  ;;  %p1465_p13 = scmp.lt.s32.totalorder %s1458_s30, %s1988_s0 }
  0x2e   : > { %p1466_p0 = scmp.lt.s32.totalorder %s1464_s17, %s1459_s14 }
  0x2f   : > { %p1462_p10 = pnand %p1461_p9, %p1460_p8 }
  0x30   : > { %p1467_p2 = por %p1466_p0, %p1465_p13 }
  0x31   : > { %p1463_p11 = pneg %p1462_p10 }
  0x33   : > { %p1468_p5 = pnand %p1467_p2, %p1463_p11 }
  0x35   : > { %1471 = shalt.err (!%p1468_p5)
}
  0x36   : > { %1317 = dma.hbm_to_vmem [thread:$0]  (!%p1756_p7), %s401_s15, 128, %s403_s25, %s391_s16  }
  0x37   : > { %s419_s13 = sshll.u32 %s417_s21, 4  ;;  %s413_s20 = scalar_lea.vmem [#allocation5], %s1747_s19  ;;  %s420_s13 = int_to_ptr.hbm [resolvable:$true] %s419_s13 }
  0x38   : > { %s421_s24 = sshll.u32 %s413_s20, 4  ;;  %s410_s5 = scalar_lea.sflag [#allocation6], %s409_s11  ;;  %s422_s24 = int_to_ptr.vmem [resolvable:$true] %s421_s24 }
  0x39   : > { %s1487_s8 = sshra.s32 %s420_s13, 4  ;;  %s1494_s17 = scalar_lea.hbm %s1989_s1, 16  ;;  %s1488_s8 = int_to_ptr.hbm [resolvable:$true] %s1487_s8 }
  0x3a   : > { %s1489_s12 = scalar_lea.hbm %s1488_s8, 8  ;;  %p1495_p5 = scmp.lt.s32.totalorder %s1488_s8, %s1989_s1 }
  0x3b   : > { %p1490_p8 = scmp.ne.s32.totalorder %s1488_s8, %s1489_s12  ;;  %p1496_p13 = scmp.lt.s32.totalorder %s1494_s17, %s1489_s12 }
  0x3d   : > { %p1492_p10 = pnand %p1490_p8, %p1461_p9  ;;  %p1497_p0 = por %p1496_p13, %p1495_p5 }
  0x3f   : > { %p1493_p11 = pneg %p1492_p10 }
  0x41   : > { %p1498_p2 = pnand %p1497_p0, %p1493_p11 }
  0x43   : > { %1501 = shalt.err (!%p1498_p2)
}
  0x44   : > { %1320 = dma.hbm_to_vmem [thread:$0]  (!%p1756_p7), %s420_s13, 128, %s422_s24, %s410_s5  }
  0x45   : > { %430 = sbr.rel (%p1699_p3) target bundleno = 2223 (0x8af), region = 68  ;;  %s1792_s11 = sand.u32 (!%p1699_p3), 1, %s1587_s22  }
  0x46   : > { %s1795_s21 = sshll.u32 (!%p1699_p3), %s1792_s11, 3  ;;  %s433_s16 = scalar_lea.sflag (!%p1699_p3), [#allocation3], %s1792_s11 }
  0x47   : > { %s436_s12 = scalar_lea.vmem (!%p1699_p3), [#allocation2], %s1795_s21 }
  0x4a   : > { %1562 = dma.done.wait (%p1732_p12), %s433_s16, 128  }
  0x4b   : > { %1564 = vsyncadd (%p1732_p12), %s433_s16, 4294967168  ;;  %s442_s23 = sand.u32 1, %s1694_s28   ;;  %s446_s29 = scalar_lea.vmem [#allocation5], %s1795_s21 }
  0x4c   : > { %s443_s24 = scalar_lea.sflag [#allocation6], %s442_s23 }
  0x4d   : > { %1566 = dma.done.wait (%p1732_p12), %s443_s24, 128  }
  0x4e   : > { %1568 = vsyncadd (%p1732_p12), %s443_s24, 4294967168 }
  0x4f   : > { %1570 = dma.done.wait (%p53_p1), [#allocation6], 512  }
  0x50   : > { %1572 = vsyncadd (%p53_p1), [#allocation6], 4294966784 }
  0x51   : > { %1574 = dma.done.wait (%p53_p1), [#allocation9], 512  }
  0x52   : > { %1576 = vsyncadd (%p53_p1), [#allocation9], 4294966784  ;;  %v536_v0 = vld [vmem:[%s1991_s3 + $0x18] sm:$0xff]  ;;  %v535_v2 = vld [vmem:[%s1991_s3 + $0x10] sm:$0xff]  ;;  %vm509_vm0 = vcmask 261120   ;;  %vm589_vm1 = vcmask 64512  }
  0x53   : > { %v508_v1 = vld [vmem:[%s1990_s2 + $0x18] sm:$0xff]  ;;  %552 = vmatpush.msra.mxu1 %v536_v0  ;;  %v507_v3 = vld [vmem:[%s1990_s2 + $0x10] sm:$0xff]  ;;  %v534_v4 = vld [vmem:[%s1991_s3 + $0x8] sm:$0xff]  ;;  %s1601_s19 = smov 112   ;;  %s1602_s25 = smov 120  }
  0x54   : > { %525 = vmatpush.msra.mxu0 %v508_v1  ;;  %v506_v5 = vld [vmem:[%s1990_s2 + $0x8] sm:$0xff]  ;;  %v533_v6 = vld [vmem:[%s1991_s3] sm:$0xff]  ;;  %v504_v8 = vld [vmem:[%s446_s29] sm:$0xff]  ;;  %s1290_s26 = sshll.u32 %s1694_s28, 3  ;;  %s2031_s13 = sld [smem:[#allocation25_spill]] }
  0x55   : > { %553 = vmatpush.msra.mxu1 %v535_v2  ;;  %v505_v7 = vld [vmem:[%s1990_s2] sm:$0xff]  ;;  %v563_v18 = vld [vmem:[%s1992_s4 + $0x18] sm:$0xff]  ;;  %v562_v19 = vld [vmem:[%s1992_s4 + $0x10] sm:$0xff]  ;;  %s502_s28 = scalar_lea.vmem [#allocation10], %s1795_s21  ;;  %s1126_s5 = scalar_lea.sflag [#allocation4], %s1792_s11 }
  0x56   : > { %526 = vmatpush.msra.mxu0 %v507_v3  ;;  %v503_v9 = vld [vmem:[%s436_s12] sm:$0xff]  ;;  %s1603_s12 = smov 104   ;;  %576 = vmatpush.msra.mxu2 %v563_v18  ;;  %s1138_s27 = sshll.u32 %s502_s28, 4  ;;  %s1139_s27 = int_to_ptr.vmem [resolvable:$true] %s1138_s27 }
  0x57   : > { %554 = vmatpush.msra.mxu1 %v534_v4  ;;  %v561_v20 = vld [vmem:[%s1992_s4 + $0x8] sm:$0xff]  ;;  %v560_v21 = vld [vmem:[%s1992_s4] sm:$0xff] }
  0x58   : > { %527 = vmatpush.msra.mxu0 %v506_v5  ;;  %577 = vmatpush.msra.mxu2 %v562_v19  ;;  %v585_v30 = vld [vmem:[#allocation7] sm:$0xff]  ;;  %v586_v19 = vld [vmem:[#allocation7 + $0x8] sm:$0xff] }
  0x59   : > { %555 = vmatpush.msra.mxu1 %v533_v6 }
  0x5a   : > { %528 = vmatpush.msra.mxu0 %v505_v7  ;;  %1269 = vmatmul.msk.f32.vlgmr.msra.gmra.mxu1 %vm509_vm0, %v504_v8 }
  0x5b   : > { %1268 = vmatmul.msk.f32.vlgmr.msra.gmra.mxu0 %vm509_vm0, %v503_v9  ;;  %578 = vmatpush.msra.mxu2 %v561_v20 }
  0x5d   : > { %579 = vmatpush.msra.mxu2 %v560_v21 }
  0x5e   : > { %1270 = vmatmul.msk.f32.vlgmr.msra.gmra.mxu2 %vm509_vm0, %v504_v8 }
  0x5f   : > { %760 = vmatpush.msrb.mxu2 %v586_v19 }
  0xd7   : > { %v557_v10 = vpop.f32.mrf.mxu1 }
  0xd8   : > { %v1843_v11 = vpop.f32.mrf.mxu0  ;;  %790 = vrot.lane.b32.xlu2 %v557_v10, %s1601_s19  ;;  %665 = vrot.lane.b32.xlu1 %v557_v10, %s1602_s25 }
  0xd9   : > { %v584_v12 = vmul.f32 0.35355338, %v1843_v11  ;;  %1271 = vmatpush.xpose.msk.msrb.mxu0 %vm589_vm1, %v557_v10 }
  0xdc   : > { %1272 = vmatmul.msk.f32.vlgmr.msrb.gmra.mxu0 %vm589_vm1, %v584_v12 }
  0xe0   : > { %892 = vrot.lane.b32.xlu2 %v557_v10, %s1603_s12  ;;  %663 = vrot.lane.b32.xlu1 %v584_v12, %s1602_s25 }
  0xe1   : > { %v1873_v31 = vpop.f32.mrf.mxu2 }
  0xe2   : > { %658 = vmatpush.msra.mxu3 %v1873_v31 }
  0xe4   : > { %783 = vmatpush.msrb.mxu3 %v585_v30 }
  0xe8   : > { %890 = vrot.lane.b32.xlu1 %v584_v12, %s1603_s12 }
 0x132   : > { %v791_v14 = vpop.permute.xlu2 %790 }
 0x13a   : > { %v893_v29 = vpop.permute.xlu2 %892 }
 0x14a   : > { %v666_v13 = vpop.permute.xlu1 %665 }
 0x14b   : > { %1274 = vmatpush.xpose.msk.msra.mxu0 %vm589_vm1, %v666_v13 }
 0x14f   : > { %1279 = vmatpush.xpose.msk.msrb.mxu0 %vm589_vm1, %v791_v14 }
 0x152   : > { %v664_v15 = vpop.permute.xlu1 %663 }
 0x153   : > { %1275 = vmatmul.msk.f32.vlgmr.msra.gmra.mxu0 %vm589_vm1, %v664_v15 }
 0x159   : > { %v613_v16 = vpop.f32.mrf.mxu0 }
 0x15a   : > { %v616_v17 = vsel %vm589_vm1, %v613_v16, -inf  ;;  %v891_v53 = vpop.permute.xlu1 %890 }
 0x15b   : > { %617 = vmax.xlane.f32.xlu0 %v616_v17 }
 0x1ce   : > { %v618_v22 = vpop.xlane.xlu0 %617 }
 0x1cf   : > { %v619_v23 = vsub.f32 %v613_v16, %v618_v22 }
 0x1d0   : > { %v688_v24 = vpop.f32.mrf.mxu0 }
 0x1d1   : > { %v620_v25 = vmul.f32 1.442695, %v619_v23  ;;  %v691_v26 = vsel %vm589_vm1, %v688_v24, -inf }
 0x1d2   : > { %692 = vmax.xlane.f32.xlu2 %v691_v26 }
 0x1d3   : > { %1375 = vpow2.f32 %v620_v25 }
 0x1d9   : > { %v1376_v27 = vpop.eup %1375 }
 0x1da   : > { %v622_v28 = vsel %vm589_vm1, %v1376_v27, 0.0 }
 0x1db   : > { %623 = vadd.xlane.f32.xlu0 %v622_v28 }
 0x1ef   : > { %788 = vrot.lane.b32.xlu0 %v584_v12, %s1601_s19 }
 0x245   : > { %v693_v32 = vpop.xlane.xlu2 %692 }
 0x246   : > { %v694_v33 = vsub.f32 %v688_v24, %v693_v32 }
 0x248   : > { %v695_v34 = vmul.f32 1.442695, %v694_v33 }
 0x24a   : > { %1377 = vpow2.f32 %v695_v34 }
 0x24e   : > { %v624_v35 = vpop.xlane.xlu0 %623 }
 0x24f   : > { %1379 = vrcp.f32 %v624_v35  ;;  %v636_v41 = vand.u32 2147483648, %v624_v35  ;;  %v634_v43 = vand.u32 2147483647, %v624_v35  ;;  %vm630_vm3 = vweird.f32 %v624_v35 }
 0x250   : > { %v1378_v36 = vpop.eup %1377 }
 0x251   : > { %v697_v37 = vsel %vm589_vm1, %v1378_v36, 0.0  ;;  %v637_v45 = vor.u32 1.1754944e-38, %v636_v41  ;;  %vm635_vm5 = vcmp.eq.f32.partialorder %v634_v43, 8.507059e+37 }
 0x252   : > { %698 = vadd.xlane.f32.xlu2 %v697_v37 }
 0x255   : > { %v1380_v38 = vpop.eup %1379 }
 0x256   : > { %v626_v39 = vmul.f32 %v1380_v38, %v624_v35  ;;  %vm631_vm2 = vweird.f32 %v1380_v38 }
 0x257   : > { %vm632_vm4 = vmor %vm630_vm3, %vm631_vm2 }
 0x258   : > { %v627_v40 = vsub.f32 1.0, %v626_v39 }
 0x25a   : > { %v628_v42 = vmul.f32 %v1380_v38, %v627_v40 }
 0x25c   : > { %v629_v44 = vadd.f32 %v1380_v38, %v628_v42 }
 0x25e   : > { %v633_v46 = vsel %vm632_vm4, %v1380_v38, %v629_v44 }
 0x25f   : > { %v638_v47 = vsel %vm635_vm5, %v637_v45, %v633_v46  ;;  %v588_v45 = vld [vmem:[#allocation7 + $0x18] sm:$0xff]  ;;  %v587_v46 = vld [vmem:[#allocation7 + $0x10] sm:$0xff] }
 0x260   : > { %v639_v48 = vmul.f32 %v1376_v27, %v638_v47  ;;  %884 = vmatpush.msra.mxu2 %v587_v46 }
 0x261   : > { %v789_v49 = vpop.permute.xlu0 %788 }
 0x262   : > { %1273 = vmatmul.msk.f32.vlgmr.msra.gmra.mxu3 %vm589_vm1, %v639_v48  ;;  %1280 = vmatmul.msk.f32.vlgmr.msrb.gmra.mxu0 %vm589_vm1, %v789_v49 }
 0x263   : > { %1283 = vmatpush.xpose.msk.msra.mxu3 %vm589_vm1, %v893_v29 }
 0x2c5   : > { %v699_v62 = vpop.xlane.xlu2 %698 }
 0x2c6   : > { %v711_v4 = vand.u32 2147483648, %v699_v62  ;;  %vm705_vm7 = vweird.f32 %v699_v62  ;;  %v709_v5 = vand.u32 2147483647, %v699_v62 }
 0x2c8   : > { %v712_v8 = vor.u32 1.1754944e-38, %v711_v4  ;;  %vm710_vm9 = vcmp.eq.f32.partialorder %v709_v5, 8.507059e+37  ;;  %v1035_v4 = vld [vmem:[#allocation8 + $0x18] sm:$0xff]  ;;  %v1034_v5 = vld [vmem:[#allocation8 + $0x10] sm:$0xff] }
 0x2df   : > { %v813_v50 = vpop.f32.mrf.mxu0 }
 0x2e0   : > { %v816_v51 = vsel %vm589_vm1, %v813_v50, -inf }
 0x2e1   : > { %817 = vmax.xlane.f32.xlu1 %v816_v51 }
 0x2e5   : > { %v660_v52 = vpop.f32.mrf.mxu3 }
 0x2e6   : > { %1278 = vmatmul.msk.f32.vlgmr.msrb.gmra.mxu3 %vm589_vm1, %v660_v52 }
 0x2ee   : > { %1284 = vmatmul.msk.f32.vlgmr.msra.gmra.mxu3 %vm589_vm1, %v891_v53 }
 0x354   : > { %v818_v54 = vpop.xlane.xlu1 %817 }
 0x355   : > { %v819_v55 = vsub.f32 %v813_v50, %v818_v54 }
 0x357   : > { %v820_v56 = vmul.f32 1.442695, %v819_v55 }
 0x359   : > { %1381 = vpow2.f32 %v820_v56 }
 0x35a   : > { %1383 = vrcp.f32 %v699_v62 }
 0x35f   : > { %v1883_v57 = vpop.eup %1381 }
 0x360   : > { %v822_v58 = vsel %vm589_vm1, %v1883_v57, 0.0  ;;  %v1384_v63 = vpop.eup %1383 }
 0x361   : > { %823 = vadd.xlane.f32.xlu2 %v822_v58  ;;  %v701_v0 = vmul.f32 %v1384_v63, %v699_v62  ;;  %vm706_vm6 = vweird.f32 %v1384_v63 }
 0x362   : > { %vm707_vm8 = vmor %vm705_vm7, %vm706_vm6  ;;  %vm1068_vm7 = vcmask 523264  }
 0x363   : > { %v702_v1 = vsub.f32 1.0, %v701_v0 }
 0x365   : > { %v703_v2 = vmul.f32 %v1384_v63, %v702_v1 }
 0x367   : > { %v704_v3 = vadd.f32 %v1384_v63, %v703_v2 }
 0x369   : > { %v1887_v59 = vpop.f32.mrf.mxu3  ;;  %v708_v7 = vsel %vm707_vm8, %v1384_v63, %v704_v3 }
 0x36a   : > { %v713_v9 = vsel %vm710_vm9, %v712_v8, %v708_v7  ;;  %v1032_v7 = vld [vmem:[#allocation8] sm:$0xff]  ;;  %v1067_v8 = vld [vmem:[%s1997_s9 + $0x38] sm:$0xff] }
 0x36b   : > { %v714_v12 = vmul.f32 %v1378_v36, %v713_v9  ;;  %v1066_v9 = vld [vmem:[%s1997_s9 + $0x30] sm:$0xff]  ;;  %1080 = vmatpush.msrb.mxu3 %v1067_v8 }
 0x36d   : > { %1081 = vmatpush.msrb.mxu3 %v1066_v9 }
 0x371   : > { %v915_v60 = vpop.f32.mrf.mxu3 }
 0x372   : > { %v918_v61 = vsel %vm589_vm1, %v915_v60, -inf }
 0x373   : > { %919 = vmax.xlane.f32.xlu0 %v918_v61 }
 0x379   : > { %716 = vrot.lane.b32.xlu2 %v1873_v31, %s1602_s25 }
 0x387   : > { %942 = vrot.lane.b32.xlu0 %v1873_v31, %s1603_s12 }
 0x3d4   : > { %v824_v6 = vpop.xlane.xlu2 %823 }
 0x3d5   : > { %v836_v34 = vand.u32 2147483648, %v824_v6  ;;  %vm830_vm14 = vweird.f32 %v824_v6  ;;  %v834_v36 = vand.u32 2147483647, %v824_v6 }
 0x3d7   : > { %v837_v41 = vor.u32 1.1754944e-38, %v836_v34  ;;  %vm835_vm3 = vcmp.eq.f32.partialorder %v834_v36, 8.507059e+37 }
 0x3dc   : > { %v717_v10 = vpop.permute.xlu2 %716 }
 0x3dd   : > { %737 = vmatpush.msrb.mxu1 %v717_v10  ;;  %v1065_v10 = vld [vmem:[%s1997_s9 + $0x28] sm:$0xff] }
 0x3de   : > { %1276 = vmatmul.msk.f32.vlgmr.msrb.gmra.mxu1 %vm589_vm1, %v714_v12  ;;  %1082 = vmatpush.msrb.mxu3 %v1065_v10 }
 0x3e6   : > { %v920_v13 = vpop.xlane.xlu0 %919 }
 0x3e7   : > { %v921_v14 = vsub.f32 %v915_v60, %v920_v13 }
 0x3e9   : > { %v922_v15 = vmul.f32 1.442695, %v921_v14  ;;  %v1064_v14 = vld [vmem:[%s1997_s9 + $0x20] sm:$0xff] }
 0x3ea   : > { %1083 = vmatpush.msrb.mxu3 %v1064_v14 }
 0x3eb   : > { %1385 = vpow2.f32 %v922_v15 }
 0x3ec   : > { %1387 = vrcp.f32 %v824_v6 }
 0x3f1   : > { %v1386_v16 = vpop.eup %1385 }
 0x3f2   : > { %v924_v17 = vsel %vm589_vm1, %v1386_v16, 0.0  ;;  %v1388_v21 = vpop.eup %1387 }
 0x3f3   : > { %925 = vadd.xlane.f32.xlu1 %v924_v17  ;;  %v826_v23 = vmul.f32 %v1388_v21, %v824_v6  ;;  %vm831_vm11 = vweird.f32 %v1388_v21  ;;  %v1033_v6 = vld [vmem:[#allocation8 + $0x8] sm:$0xff]  ;;  %v1062_v17 = vld [vmem:[%s1997_s9 + $0x10] sm:$0xff] }
 0x3f4   : > { %vm832_vm2 = vmor %vm830_vm14, %vm831_vm11 }
 0x3f5   : > { %v827_v24 = vsub.f32 1.0, %v826_v23 }
 0x3f7   : > { %v828_v27 = vmul.f32 %v1388_v21, %v827_v24  ;;  %v1371_v24 = vld [vmem:[%s1994_s6] ss:$0 sm:$0xff] }
 0x3f9   : > { %v943_v18 = vpop.permute.xlu0 %942 }
 0x3fa   : > { %963 = vmatpush.msra.mxu0 %v943_v18 }
 0x40c   : > { %840 = vrot.lane.b32.xlu1 %v1873_v31, %s1601_s19  ;;  %v829_v31 = vadd.f32 %v1388_v21, %v828_v27  ;;  %v1372_v27 = vld [vmem:[%s1995_s7] ss:$0 sm:$0xff]  ;;  %s2029_s19 = sld [smem:[#allocation26_spill]] }
 0x40e   : > { %v833_v39 = vsel %vm832_vm2, %v1388_v21, %v829_v31 }
 0x40f   : > { %v838_v42 = vsel %vm835_vm3, %v837_v41, %v833_v39 }
 0x410   : > { %v839_v44 = vmul.f32 %v1883_v57, %v838_v42  ;;  %v1604_v57 = vmov 32.0  }
 0x412   : > { %s1136_s25 = scalar_lea.hbm %s2029_s19, %s1290_s26  ;;  %s1537_s21 = scalar_lea.hbm %s2029_s19, 16 }
 0x413   : > { %s1140_s20 = sshll.u32 %s1136_s25, 4  ;;  %s1141_s20 = int_to_ptr.hbm [resolvable:$true] %s1140_s20 }
 0x414   : > { %s1531_s8 = sshra.s32 %s1141_s20, 4  ;;  %s1532_s8 = int_to_ptr.hbm [resolvable:$true] %s1531_s8 }
 0x415   : > { %s1533_s30 = scalar_lea.hbm %s1532_s8, 8  ;;  %p1538_p7 = scmp.lt.s32.totalorder %s1532_s8, %s2029_s19 }
 0x416   : > { %p1534_p1 = scmp.ne.s32.totalorder %s1532_s8, %s1533_s30  ;;  %p1539_p9 = scmp.lt.s32.totalorder %s1537_s21, %s1533_s30 }
 0x418   : > { %p1535_p3 = pnand %p1534_p1, %p1739_p4  ;;  %p1540_p8 = por %p1539_p9, %p1538_p7 }
 0x41a   : > { %p1536_p12 = pneg %p1535_p3 }
 0x41c   : > { %p1541_p10 = pnand %p1540_p8, %p1536_p12 }
 0x45b   : > { %v739_v20 = vpop.f32.mrf.mxu1 }
 0x45c   : > { %1277 = vmatmul.msk.f32.vlgmr.msrb.gmra.mxu2 %vm589_vm1, %v739_v20 }
 0x45d   : > { %1051 = vmatpush.msrb.mxu2 %v1035_v4 }
 0x45f   : > { %1052 = vmatpush.msrb.mxu2 %v1034_v5 }
 0x461   : > { %1053 = vmatpush.msrb.mxu2 %v1033_v6 }
 0x463   : > { %1054 = vmatpush.msrb.mxu2 %v1032_v7 }
 0x466   : > { %v926_v22 = vpop.xlane.xlu1 %925 }
 0x467   : > { %1389 = vrcp.f32 %v926_v22  ;;  %v938_v29 = vand.u32 2147483648, %v926_v22  ;;  %v936_v32 = vand.u32 2147483647, %v926_v22  ;;  %vm932_vm12 = vweird.f32 %v926_v22 }
 0x468   : > { %1391 = vrcp.f32 %v1604_v57 }
 0x469   : > { %v939_v35 = vor.u32 1.1754944e-38, %v938_v29  ;;  %vm937_vm15 = vcmp.eq.f32.partialorder %v936_v32, 8.507059e+37  ;;  %v1060_v32 = vld [vmem:[%s1997_s9] sm:$0xff] }
 0x46d   : > { %v1390_v25 = vpop.eup %1389 }
 0x46e   : > { %v928_v26 = vmul.f32 %v1390_v25, %v926_v22  ;;  %vm933_vm10 = vweird.f32 %v1390_v25  ;;  %v1392_v58 = vpop.eup %1391 }
 0x46f   : > { %vm934_vm13 = vmor %vm932_vm12, %vm933_vm10  ;;  %v999_v60 = vmul.f32 32.0, %v1392_v58 }
 0x470   : > { %v929_v28 = vsub.f32 1.0, %v928_v26 }
 0x471   : > { %v1000_v61 = vsub.f32 1.0, %v999_v60 }
 0x472   : > { %v930_v30 = vmul.f32 %v1390_v25, %v929_v28 }
 0x473   : > { %v1001_v62 = vmul.f32 %v1392_v58, %v1000_v61 }
 0x474   : > { %v931_v33 = vadd.f32 %v1390_v25, %v930_v30  ;;  %v1061_v30 = vld [vmem:[%s1997_s9 + $0x8] sm:$0xff] }
 0x475   : > { %v1002_v63 = vadd.f32 %v1392_v58, %v1001_v62 }
 0x476   : > { %v935_v37 = vsel %vm934_vm13, %v1390_v25, %v931_v33 }
 0x477   : > { %v940_v38 = vsel %vm937_vm15, %v939_v35, %v935_v37 }
 0x478   : > { %v941_v40 = vmul.f32 %v1386_v16, %v940_v38  ;;  %v1063_v16 = vld [vmem:[%s1997_s9 + $0x18] sm:$0xff] }
 0x479   : > { %1084 = vmatpush.msrb.mxu3 %v1063_v16 }
 0x47a   : > { %1285 = vmatmul.msk.f32.vlgmr.msra.gmra.mxu0 %vm589_vm1, %v941_v40 }
 0x47b   : > { %1085 = vmatpush.msrb.mxu3 %v1062_v17 }
 0x47d   : > { %1086 = vmatpush.msrb.mxu3 %v1061_v30 }
 0x47e   : > { %v841_v43 = vpop.permute.xlu1 %840 }
 0x47f   : > { %861 = vmatpush.msra.mxu1 %v841_v43  ;;  %1087 = vmatpush.msrb.mxu3 %v1060_v32 }
 0x480   : > { %1281 = vmatmul.msk.f32.vlgmr.msra.gmra.mxu1 %vm589_vm1, %v839_v44 }
 0x481   : > { %986 = vmatpush.msrb.mxu1 %v588_v45 }
 0x4df   : > { %v762_v49 = vpop.f32.mrf.mxu2 }
 0x4e0   : > { %v786_v50 = vadd.f32 %v1887_v59, %v762_v49 }
 0x4f7   : > { %v965_v47 = vpop.f32.mrf.mxu0 }
 0x4f8   : > { %1286 = vmatmul.msk.f32.vlgmr.msrb.gmra.mxu1 %vm589_vm1, %v965_v47 }
 0x4fd   : > { %v863_v48 = vpop.f32.mrf.mxu1 }
 0x4fe   : > { %1282 = vmatmul.msk.f32.vlgmr.msra.gmra.mxu2 %vm589_vm1, %v863_v48  ;;  %vm1003_vm1 = vweird.f32 %v1392_v58 }
 0x4ff   : > { %v1907_v0 = vsel %vm1003_vm1, %v1392_v58, %v1002_v63 }
 0x575   : > { %v988_v53 = vpop.f32.mrf.mxu1 }
 0x581   : > { %v886_v51 = vpop.f32.mrf.mxu2 }
 0x582   : > { %v889_v52 = vadd.f32 %v886_v51, %v786_v50  ;;  %v1373_v51 = vld [vmem:[%s1998_s10] ss:$0 sm:$0xff] }
 0x584   : > { %v991_v54 = vadd.f32 %v988_v53, %v889_v52 }
 0x586   : > { %v992_v55 = vadd.f32 %v991_v54, %v1843_v11  ;;  %v1374_v54 = vld [vmem:[%s2031_s13] ss:$0 sm:$0xff] }
 0x588   : > { %v995_v56 = vsel %vm509_vm0, %v992_v55, 0.0 }
 0x589   : > { %996 = vadd.xlane.f32.xlu2 %v995_v56 }
 0x5fc   : > { %v997_v59 = vpop.xlane.xlu2 %996 }
 0x5fd   : > { %v1005_v1 = vmul.f32 %v1907_v0, %v997_v59 }
 0x5ff   : > { %v1006_v2 = vsub.f32 %v992_v55, %v1005_v1 }
 0x601   : > { %v1007_v3 = vmul.f32 %v1006_v2, %v1006_v2 }
 0x603   : > { %v1008_v11 = vsel %vm509_vm0, %v1007_v3, 0.0 }
 0x604   : > { %1009 = vadd.xlane.f32.xlu0 %v1008_v11 }
 0x677   : > { %v1010_v12 = vpop.xlane.xlu0 %1009 }
 0x678   : > { %v1011_v13 = vmul.f32 %v1010_v12, %v1907_v0 }
 0x67a   : > { %v1012_v15 = vadd.f32 1e-05, %v1011_v13 }
 0x67c   : > { %1393 = vrsqrt.f32 %v1012_v15  ;;  %vm1019_vm5 = vweird.f32 %v1012_v15 }
 0x682   : > { %v1394_v18 = vpop.eup %1393 }
 0x683   : > { %v1014_v19 = vmul.f32 %v1394_v18, %v1012_v15  ;;  %vm1020_vm4 = vweird.f32 %v1394_v18 }
 0x684   : > { %vm1021_vm6 = vmor %vm1019_vm5, %vm1020_vm4 }
 0x685   : > { %v1015_v20 = vmul.f32 %v1394_v18, %v1014_v19 }
 0x687   : > { %v1016_v21 = vmul.f32 0.5, %v1015_v20 }
 0x689   : > { %v1017_v22 = vsub.f32 1.5, %v1016_v21 }
 0x68b   : > { %v1018_v23 = vmul.f32 %v1394_v18, %v1017_v22 }
 0x68d   : > { %v1022_v25 = vsel %vm1021_vm6, %v1394_v18, %v1018_v23 }
 0x68e   : > { %v1023_v26 = vmul.f32 %v1022_v25, %v1006_v2 }
 0x690   : > { %v1027_v28 = vmul.f32 %v1371_v24, %v1023_v26 }
 0x692   : > { %v1031_v29 = vadd.f32 %v1372_v27, %v1027_v28 }
 0x694   : > { %1287 = vmatmul.msk.f32.vlgmr.msrb.gmra.mxu2 %vm509_vm0, %v1031_v29 }
 0x717   : > { %v1056_v31 = vpop.f32.mrf.mxu2 }
 0x718   : > { %v1059_v33 = vmax.f32 %v1056_v31, 0.0 }
 0x71a   : > { %1288 = vmatmul.msk.f32.vlgmr.msrb.gmra.mxu3 %vm1068_vm7, %v1059_v33 }
 0x79d   : > { %v1089_v34 = vpop.f32.mrf.mxu3 }
 0x79e   : > { %v1090_v35 = vadd.f32 %v1089_v34, %v1031_v29 }
 0x7a0   : > { %v1094_v36 = vsel %vm509_vm0, %v1090_v35, 0.0 }
 0x7a1   : > { %1095 = vadd.xlane.f32.xlu1 %v1094_v36 }
 0x814   : > { %v1096_v37 = vpop.xlane.xlu1 %1095 }
 0x815   : > { %v1097_v38 = vmul.f32 %v1096_v37, %v1907_v0 }
 0x817   : > { %v1098_v39 = vsub.f32 %v1090_v35, %v1097_v38 }
 0x819   : > { %v1099_v40 = vmul.f32 %v1098_v39, %v1098_v39 }
 0x81b   : > { %v1100_v41 = vsel %vm509_vm0, %v1099_v40, 0.0 }
 0x81c   : > { %1101 = vadd.xlane.f32.xlu2 %v1100_v41 }
 0x88f   : > { %v1102_v42 = vpop.xlane.xlu2 %1101 }
 0x890   : > { %v1103_v43 = vmul.f32 %v1102_v42, %v1907_v0 }
 0x892   : > { %v1104_v44 = vadd.f32 1e-05, %v1103_v43 }
 0x894   : > { %1395 = vrsqrt.f32 %v1104_v44  ;;  %vm1111_vm9 = vweird.f32 %v1104_v44 }
 0x89a   : > { %v1396_v45 = vpop.eup %1395 }
 0x89b   : > { %v1106_v46 = vmul.f32 %v1396_v45, %v1104_v44  ;;  %vm1112_vm8 = vweird.f32 %v1396_v45 }
 0x89c   : > { %vm1113_vm10 = vmor %vm1111_vm9, %vm1112_vm8 }
 0x89d   : > { %v1107_v47 = vmul.f32 %v1396_v45, %v1106_v46 }
 0x89f   : > { %v1108_v48 = vmul.f32 0.5, %v1107_v47 }
 0x8a1   : > { %v1109_v49 = vsub.f32 1.5, %v1108_v48 }
 0x8a3   : > { %v1110_v50 = vmul.f32 %v1396_v45, %v1109_v49 }
 0x8a5   : > { %v1114_v52 = vsel %vm1113_vm10, %v1396_v45, %v1110_v50 }
 0x8a6   : > { %v1115_v53 = vmul.f32 %v1114_v52, %v1098_v39 }
 0x8a8   : > { %v1119_v55 = vmul.f32 %v1373_v51, %v1115_v53 }
 0x8aa   : > { %v1123_v56 = vadd.f32 %v1374_v54, %v1119_v55 }
 0x8ac   : > { %1124 = vst.msk [vmem:[%s502_s28] sm:$0xff] %vm509_vm0, %v1123_v56 }
 0x8ad   : > { %1544 = shalt.err (!%p1541_p10)
}
 0x8ae   : > { %1305 = dma.vmem_to_hbm [thread:$0]  (%p1739_p4), %s1139_s27, 128, %s1141_s20, %s1126_s5  }
 0x8af PF: > { %s2032_s11 = sld [smem:[#allocation16_spill]] }
 0x8b0   : > { %s2034_s23 = sld [smem:[#allocation18_spill]] }
 0x8b5   : > { %s1152_s24 = sand.u32 1, %s2032_s11  }
 0x8b6   : > { %p2035_p11 = scmp.ge.s32.totalorder %s2034_s23, 2  ;;  %s1153_s25 = scalar_lea.sflag [#allocation4], %s1152_s24 }
 0x8b8   : > { %p1322_p5 = pnand %p2035_p11, %p1743_p6 }
 0x8ba   : > { %p1323_p13 = pneg %p1322_p5 }
 0x8bc   : > { %1578 = dma.done.wait (%p1323_p13), %s1153_s25, 128  }
 0x8bd   : > { %1580 = vsyncadd (%p1323_p13), %s1153_s25, 4294967168  ;;  %s2036_s24 = sld [smem:[#allocation19_spill]]  ;;  %s2039_s21 = smov %s1587_s22 }
 0x8be   : > { %s2037_s29 = sld [smem:[#allocation17_spill]] }
 0x8bf   : > { %s2038_s23 = sld [smem:[#allocation20_spill]] }
 0x8c3   : > { %p29_p0 = scmp.ge.s32.totalorder %s2036_s24, 4  }
 0x8c4   : > { %s2040_s22 = smov %s2037_s29 }
 0x8c5   :  { %31 = sbr.rel (!%p29_p0) target bundleno = 13 (0xd), region = 134 }
 0x8ca   :  { %1159 = vsyncpa [#allocation3], 1 }
 0x8cb   :  { %1161 = vsyncpa [#allocation3 + $0x1], 1 }
 0x8cc   :  { %1162 = vsyncpa [#allocation6], 1 }
 0x8cd   :  { %1164 = vsyncpa [#allocation6 + $0x1], 1 }
 0x8ce   :  { %1165 = vsyncpa [#allocation9], 1 }
 0x8cf   :  { %1166 = vsyncpa [#allocation4], 1 }
 0x8d0   :  { %1168 = vsyncpa [#allocation4 + $0x1], 1 }

</bundles_post_ra>
